<compile_context>
chip_gen: v7x
topology: tpu7x:2x2x1
jax: 0.10.0
libtpu: 0.0.40
codegen_flags: <defaults>
</compile_context>

<pallas_src>
import jax
import jax.numpy as jnp
from jax.experimental import pallas as pl
from jax.experimental.pallas import tpu as pltpu

IMG_SIZE = 28
IN_FEATURES = IMG_SIZE * IMG_SIZE          # 784
HIDDEN_SIZE = 500
NUM_CLASSES = 10

HIDDEN_PAD = 512                            # 500 -> 512 (clean MXU passes)
OUT_PAD = 128                               # 10  -> 128 (lane-dense output store)


def _round_up(x, m):
    return (x + m - 1) // m * m


def mlp_kernel(x_ref,
               w1_ref, b1_ref,
               w2_ref, b2_ref,
               w3_ref, b3_ref,
               w4_ref, b4_ref,
               o_ref):
    # Four back-to-back bf16 GEMMs with f32 accumulation; bias adds in f32,
    # re-cast to bf16 between layers to feed the MXU at its native rate.
    x = x_ref[...]                                                         # (TM, 784) bf16
    h = jnp.dot(x, w1_ref[...], preferred_element_type=jnp.float32) + b1_ref[...]
    h = jnp.dot(h.astype(jnp.bfloat16), w2_ref[...],
                preferred_element_type=jnp.float32) + b2_ref[...]
    h = jnp.dot(h.astype(jnp.bfloat16), w3_ref[...],
                preferred_element_type=jnp.float32) + b3_ref[...]
    y = jnp.dot(h.astype(jnp.bfloat16), w4_ref[...],
                preferred_element_type=jnp.float32) + b4_ref[...]
    o_ref[...] = y.astype(o_ref.dtype)                                     # (TM, 128) f32


def init_params(key, img_size=IMG_SIZE, hidden=HIDDEN_SIZE, classes=NUM_CLASSES):
    """nn.Linear default init: U(-1/sqrt(fan_in), 1/sqrt(fan_in)); W stored as (in, out)."""
    dims = [(img_size * img_size, hidden),
            (hidden, hidden),
            (hidden, hidden),
            (hidden, classes)]
    params = []
    for (fan_in, fan_out) in dims:
        key, kw, kb = jax.random.split(key, 3)
        bound = 1.0 / jnp.sqrt(jnp.float32(fan_in))
        w = jax.random.uniform(kw, (fan_in, fan_out), jnp.float32, -bound, bound)
        b = jax.random.uniform(kb, (fan_out,), jnp.float32, -bound, bound)
        params.append((w, b))
    return params


def pack_params(params):
    """Zero-pad to (784,512)/(512,512)/(512,512)/(512,128), cast weights to bf16.

    Zero padding keeps the math exact; biases stay f32 (tiny, added post-accum).
    """
    (w1, b1), (w2, b2), (w3, b3), (w4, b4) = params

    def pad_to(a, shape):
        out = jnp.zeros(shape, a.dtype)
        return out.at[tuple(slice(0, s) for s in a.shape)].set(a)

    w1p = pad_to(w1, (IN_FEATURES, HIDDEN_PAD)).astype(jnp.bfloat16)
    w2p = pad_to(w2, (HIDDEN_PAD, HIDDEN_PAD)).astype(jnp.bfloat16)
    w3p = pad_to(w3, (HIDDEN_PAD, HIDDEN_PAD)).astype(jnp.bfloat16)
    w4p = pad_to(w4, (HIDDEN_PAD, OUT_PAD)).astype(jnp.bfloat16)
    b1p = pad_to(b1.reshape(1, -1), (1, HIDDEN_PAD))
    b2p = pad_to(b2.reshape(1, -1), (1, HIDDEN_PAD))
    b3p = pad_to(b3.reshape(1, -1), (1, HIDDEN_PAD))
    b4p = pad_to(b4.reshape(1, -1), (1, OUT_PAD))
    return (w1p, b1p, w2p, b2p, w3p, b3p, w4p, b4p)


def mlp_forward(x, packed):
    """x: (B, 1, 28, 28) or (B, 28, 28); returns (B, num_classes) f32."""
    batch = x.shape[0]
    x2d = jnp.reshape(x, (batch, IN_FEATURES)).astype(jnp.bfloat16)

    # Batch tile: multiple of 8 sublanes, capped so a (TM, 784) bf16 block is small.
    tm = min(256, _round_up(batch, 8))
    b_pad = _round_up(batch, tm)
    if b_pad != batch:
        x2d = jnp.zeros((b_pad, IN_FEATURES), jnp.bfloat16).at[:batch].set(x2d)
    grid = (b_pad // tm,)

    (w1, b1, w2, b2, w3, b3, w4, b4) = packed

    # Weights/biases: full-array blocks with constant index_map -> fetched once,
    # resident in VMEM across the whole batch grid.
    const = lambda i: (0, 0)
    w_spec = lambda s: pl.BlockSpec(s, const)
    x_spec = pl.BlockSpec((tm, IN_FEATURES), lambda i: (i, 0))
    o_spec = pl.BlockSpec((tm, OUT_PAD), lambda i: (i, 0))

    flops = 2 * b_pad * (IN_FEATURES * HIDDEN_PAD
                         + 2 * HIDDEN_PAD * HIDDEN_PAD
                         + HIDDEN_PAD * OUT_PAD)
    weight_bytes = 2 * (IN_FEATURES * HIDDEN_PAD + 2 * HIDDEN_PAD * HIDDEN_PAD
                        + HIDDEN_PAD * OUT_PAD)
    io_bytes = 2 * b_pad * IN_FEATURES + 4 * b_pad * OUT_PAD

    out = pl.pallas_call(
        mlp_kernel,
        out_shape=jax.ShapeDtypeStruct((b_pad, OUT_PAD), jnp.float32),
        grid_spec=pltpu.PrefetchScalarGridSpec(
            num_scalar_prefetch=0,
            grid=grid,
            in_specs=[
                x_spec,
                w_spec((IN_FEATURES, HIDDEN_PAD)), w_spec((1, HIDDEN_PAD)),
                w_spec((HIDDEN_PAD, HIDDEN_PAD)), w_spec((1, HIDDEN_PAD)),
                w_spec((HIDDEN_PAD, HIDDEN_PAD)), w_spec((1, HIDDEN_PAD)),
                w_spec((HIDDEN_PAD, OUT_PAD)), w_spec((1, OUT_PAD)),
            ],
            out_specs=o_spec,
        ),
        compiler_params=pltpu.CompilerParams(
            dimension_semantics=("parallel",),
        ),
        cost_estimate=pl.CostEstimate(
            flops=flops, transcendentals=0,
            bytes_accessed=weight_bytes + io_bytes),
    )(x2d, w1, b1, w2, b2, w3, b3, w4, b4)

    return out[:batch, :NUM_CLASSES]


def mlp_reference_f32(x, params):
    batch = x.shape[0]
    h = jnp.reshape(x, (batch, IN_FEATURES)).astype(jnp.float32)
    for (w, b) in params:
        h = h @ w + b[None, :]
    return h


def mlp_reference_bf16(x, params):
    """Same bf16-input / f32-accumulate numerics path as the kernel."""
    batch = x.shape[0]
    h = jnp.reshape(x, (batch, IN_FEATURES)).astype(jnp.bfloat16)
    out = None
    for (w, b) in params:
        out = jnp.dot(h, w.astype(jnp.bfloat16),
                      preferred_element_type=jnp.float32) + b[None, :]
        h = out.astype(jnp.bfloat16)
    return out


if __name__ == "__main__":
    key = jax.random.PRNGKey(0)
    key, kx = jax.random.split(key)

    batch = 8
    x = jax.random.normal(kx, (batch, 1, IMG_SIZE, IMG_SIZE), jnp.float32)

    params = init_params(jax.random.PRNGKey(42))
    packed = pack_params(params)

    out = mlp_forward(x, packed)
    out = jax.block_until_ready(out)
    assert out.shape == (batch, NUM_CLASSES), out.shape

    ref_bf16 = mlp_reference_bf16(x, params)
    ref_f32 = mlp_reference_f32(x, params)
    assert jnp.allclose(out, ref_bf16, atol=1e-2, rtol=1e-2), "mismatch vs bf16 reference"
    assert jnp.allclose(out, ref_f32, atol=5e-2, rtol=5e-2), "mismatch vs f32 reference"

    print("KERNEL_OK")
</pallas_src>

<mosaic_0001>
module attributes {stable_mosaic.version = 11 : i64} {
  func.func @mlp_kernel(%arg0: i32, %arg1: memref<8x784xbf16, #tpu.memory_space<vmem>>, %arg2: memref<784x512xbf16, #tpu.memory_space<vmem>>, %arg3: memref<1x512xf32, #tpu.memory_space<vmem>>, %arg4: memref<512x512xbf16, #tpu.memory_space<vmem>>, %arg5: memref<1x512xf32, #tpu.memory_space<vmem>>, %arg6: memref<512x512xbf16, #tpu.memory_space<vmem>>, %arg7: memref<1x512xf32, #tpu.memory_space<vmem>>, %arg8: memref<512x128xbf16, #tpu.memory_space<vmem>>, %arg9: memref<1x128xf32, #tpu.memory_space<vmem>>, %arg10: memref<8x128xf32, #tpu.memory_space<vmem>>) attributes {dimension_semantics = [#tpu.dimension_semantics<parallel>], iteration_bounds = array<i64: 1>, scalar_prefetch = 0 : i64, scratch_operands = 0 : i64, tpu.core_type = #tpu.core_type<tc>, window_params = [{transform_indices = @transform_0, window_bounds = array<i64: 8, 784>}, {pipeline_mode = #tpu.pipeline_mode<synchronous>, transform_indices = @transform_1, window_bounds = array<i64: 784, 512>}, {pipeline_mode = #tpu.pipeline_mode<synchronous>, transform_indices = @transform_2, window_bounds = array<i64: 1, 512>}, {pipeline_mode = #tpu.pipeline_mode<synchronous>, transform_indices = @transform_3, window_bounds = array<i64: 512, 512>}, {pipeline_mode = #tpu.pipeline_mode<synchronous>, transform_indices = @transform_4, window_bounds = array<i64: 1, 512>}, {pipeline_mode = #tpu.pipeline_mode<synchronous>, transform_indices = @transform_5, window_bounds = array<i64: 512, 512>}, {pipeline_mode = #tpu.pipeline_mode<synchronous>, transform_indices = @transform_6, window_bounds = array<i64: 1, 512>}, {pipeline_mode = #tpu.pipeline_mode<synchronous>, transform_indices = @transform_7, window_bounds = array<i64: 512, 128>}, {pipeline_mode = #tpu.pipeline_mode<synchronous>, transform_indices = @transform_8, window_bounds = array<i64: 1, 128>}, {transform_indices = @transform_9, window_bounds = array<i64: 8, 128>}]} {
    %c0 = arith.constant 0 : index
    %c0_0 = arith.constant 0 : index
    %0 = vector.load %arg1[%c0, %c0_0] : memref<8x784xbf16, #tpu.memory_space<vmem>>, vector<8x784xbf16>
    %c0_1 = arith.constant 0 : index
    %c0_2 = arith.constant 0 : index
    %1 = vector.load %arg2[%c0_1, %c0_2] : memref<784x512xbf16, #tpu.memory_space<vmem>>, vector<784x512xbf16>
    %cst = arith.constant dense<0.000000e+00> : vector<8x512xf32>
    %2 = tpu.matmul %0, %1, %cst {dimension_numbers = #tpu.dot_dimension_numbers<[1], [0], [0], [1], [0, 0, 1, 1], [], []>} : vector<8x784xbf16>, vector<784x512xbf16>, vector<8x512xf32> -> vector<8x512xf32>
    %c0_3 = arith.constant 0 : index
    %c0_4 = arith.constant 0 : index
    %3 = vector.load %arg3[%c0_3, %c0_4] : memref<1x512xf32, #tpu.memory_space<vmem>>, vector<1x512xf32>
    %4 = vector.broadcast %3 : vector<1x512xf32> to vector<8x512xf32>
    %5 = arith.addf %2, %4 : vector<8x512xf32>
    %6 = arith.truncf %5 : vector<8x512xf32> to vector<8x512xbf16>
    %c0_5 = arith.constant 0 : index
    %c0_6 = arith.constant 0 : index
    %7 = vector.load %arg4[%c0_5, %c0_6] : memref<512x512xbf16, #tpu.memory_space<vmem>>, vector<512x512xbf16>
    %cst_7 = arith.constant dense<0.000000e+00> : vector<8x512xf32>
    %8 = tpu.matmul %6, %7, %cst_7 {dimension_numbers = #tpu.dot_dimension_numbers<[1], [0], [0], [1], [0, 0, 1, 1], [], []>} : vector<8x512xbf16>, vector<512x512xbf16>, vector<8x512xf32> -> vector<8x512xf32>
    %c0_8 = arith.constant 0 : index
    %c0_9 = arith.constant 0 : index
    %9 = vector.load %arg5[%c0_8, %c0_9] : memref<1x512xf32, #tpu.memory_space<vmem>>, vector<1x512xf32>
    %10 = vector.broadcast %9 : vector<1x512xf32> to vector<8x512xf32>
    %11 = arith.addf %8, %10 : vector<8x512xf32>
    %12 = arith.truncf %11 : vector<8x512xf32> to vector<8x512xbf16>
    %c0_10 = arith.constant 0 : index
    %c0_11 = arith.constant 0 : index
    %13 = vector.load %arg6[%c0_10, %c0_11] : memref<512x512xbf16, #tpu.memory_space<vmem>>, vector<512x512xbf16>
    %cst_12 = arith.constant dense<0.000000e+00> : vector<8x512xf32>
    %14 = tpu.matmul %12, %13, %cst_12 {dimension_numbers = #tpu.dot_dimension_numbers<[1], [0], [0], [1], [0, 0, 1, 1], [], []>} : vector<8x512xbf16>, vector<512x512xbf16>, vector<8x512xf32> -> vector<8x512xf32>
    %c0_13 = arith.constant 0 : index
    %c0_14 = arith.constant 0 : index
    %15 = vector.load %arg7[%c0_13, %c0_14] : memref<1x512xf32, #tpu.memory_space<vmem>>, vector<1x512xf32>
    %16 = vector.broadcast %15 : vector<1x512xf32> to vector<8x512xf32>
    %17 = arith.addf %14, %16 : vector<8x512xf32>
    %18 = arith.truncf %17 : vector<8x512xf32> to vector<8x512xbf16>
    %c0_15 = arith.constant 0 : index
    %c0_16 = arith.constant 0 : index
    %19 = vector.load %arg8[%c0_15, %c0_16] : memref<512x128xbf16, #tpu.memory_space<vmem>>, vector<512x128xbf16>
    %cst_17 = arith.constant dense<0.000000e+00> : vector<8x128xf32>
    %20 = tpu.matmul %18, %19, %cst_17 {dimension_numbers = #tpu.dot_dimension_numbers<[1], [0], [0], [1], [0, 0, 1, 1], [], []>} : vector<8x512xbf16>, vector<512x128xbf16>, vector<8x128xf32> -> vector<8x128xf32>
    %c0_18 = arith.constant 0 : index
    %c0_19 = arith.constant 0 : index
    %21 = vector.load %arg9[%c0_18, %c0_19] : memref<1x128xf32, #tpu.memory_space<vmem>>, vector<1x128xf32>
    %22 = vector.broadcast %21 : vector<1x128xf32> to vector<8x128xf32>
    %23 = arith.addf %20, %22 : vector<8x128xf32>
    %c0_20 = arith.constant 0 : index
    %c0_21 = arith.constant 0 : index
    %24 = vector.load %arg10[%c0_20, %c0_21] : memref<8x128xf32, #tpu.memory_space<vmem>>, vector<8x128xf32>
    tpu.vector_store %arg10[%c0_20, %c0_21], %23 {strides = array<i32>} : memref<8x128xf32, #tpu.memory_space<vmem>>, vector<8x128xf32>,
    return
  }
  func.func @transform_0(%arg0: i32) -> (i32, i32) {
    %c0_i32 = arith.constant 0 : i32
    %c0_i32_0 = arith.constant 0 : i32
    return %arg0, %c0_i32 : i32, i32
  }
  func.func @transform_1(%arg0: i32) -> (i32, i32) {
    %c0_i32 = arith.constant 0 : i32
    %c0_i32_0 = arith.constant 0 : i32
    %c0_i32_1 = arith.constant 0 : i32
    return %c0_i32, %c0_i32_0 : i32, i32
  }
  func.func @transform_2(%arg0: i32) -> (i32, i32) {
    %c0_i32 = arith.constant 0 : i32
    %c0_i32_0 = arith.constant 0 : i32
    %c0_i32_1 = arith.constant 0 : i32
    return %c0_i32, %c0_i32_0 : i32, i32
  }
  func.func @transform_3(%arg0: i32) -> (i32, i32) {
    %c0_i32 = arith.constant 0 : i32
    %c0_i32_0 = arith.constant 0 : i32
    %c0_i32_1 = arith.constant 0 : i32
    return %c0_i32, %c0_i32_0 : i32, i32
  }
  func.func @transform_4(%arg0: i32) -> (i32, i32) {
    %c0_i32 = arith.constant 0 : i32
    %c0_i32_0 = arith.constant 0 : i32
    %c0_i32_1 = arith.constant 0 : i32
    return %c0_i32, %c0_i32_0 : i32, i32
  }
  func.func @transform_5(%arg0: i32) -> (i32, i32) {
    %c0_i32 = arith.constant 0 : i32
    %c0_i32_0 = arith.constant 0 : i32
    %c0_i32_1 = arith.constant 0 : i32
    return %c0_i32, %c0_i32_0 : i32, i32
  }
  func.func @transform_6(%arg0: i32) -> (i32, i32) {
    %c0_i32 = arith.constant 0 : i32
    %c0_i32_0 = arith.constant 0 : i32
    %c0_i32_1 = arith.constant 0 : i32
    return %c0_i32, %c0_i32_0 : i32, i32
  }
  func.func @transform_7(%arg0: i32) -> (i32, i32) {
    %c0_i32 = arith.constant 0 : i32
    %c0_i32_0 = arith.constant 0 : i32
    %c0_i32_1 = arith.constant 0 : i32
    return %c0_i32, %c0_i32_0 : i32, i32
  }
  func.func @transform_8(%arg0: i32) -> (i32, i32) {
    %c0_i32 = arith.constant 0 : i32
    %c0_i32_0 = arith.constant 0 : i32
    %c0_i32_1 = arith.constant 0 : i32
    return %c0_i32, %c0_i32_0 : i32, i32
  }
  func.func @transform_9(%arg0: i32) -> (i32, i32) {
    %c0_i32 = arith.constant 0 : i32
    %c0_i32_0 = arith.constant 0 : i32
    return %arg0, %c0_i32 : i32, i32
  }
}

</mosaic_0001>

<bundles_post_ra>
// kernel: tpu_custom_call.1
= control target key start
LH: loop header
LB: loop body
LE: loop exit
PB: predicated region body
PF: predicated region fallthrough
CT: control target
= control target key end

     0   :  { %14 = vsyncpa [#allocation3], 0  ;;  %s5607_s0 = inlined_call_operand.hbm [shape: bf16[8,784], index: 0, kind: input, shape index: {}]   ;;  %s5608_s1 = inlined_call_operand.hbm [shape: bf16[784,512], index: 1, kind: input, shape index: {}]   ;;  %s5609_s2 = inlined_call_operand.vmem [shape: f32[1,512], index: 2, kind: input, shape index: {}]   ;;  %s5610_s3 = inlined_call_operand.hbm [shape: bf16[512,512], index: 3, kind: input, shape index: {}]   ;;  %s5611_s4 = inlined_call_operand.vmem [shape: f32[1,512], index: 4, kind: input, shape index: {}]   ;;  %s5612_s5 = inlined_call_operand.hbm [shape: bf16[512,512], index: 5, kind: input, shape index: {}]   ;;  %s5613_s6 = inlined_call_operand.vmem [shape: f32[1,512], index: 6, kind: input, shape index: {}]   ;;  %s5614_s7 = inlined_call_operand.hbm [shape: bf16[512,128], index: 7, kind: input, shape index: {}]   ;;  %s5615_s8 = inlined_call_operand.vmem [shape: f32[1,128], index: 8, kind: input, shape index: {}]   ;;  %s5616_s9 = inlined_call_operand.hbm [shape: f32[8,128], index: 9, kind: output, shape index: {}]  }
   0x1   :  { %15 = vsyncpa [#allocation6], 0 }
   0x2   :  { %16 = vsyncpa [#allocation9], 0 }
   0x3   :  { %17 = vsyncpa [#allocation4], 0  ;;  %s5397_s30 = smov [#allocation5]   ;;  %s5257_s13 = scalar_lea.hbm %s5608_s1, 25088 }
   0x4   :  { %s33_s10 = sshll.u32 %s5397_s30, 4  ;;  %p5258_p0 = scmp.ne.s32.totalorder %s5608_s1, %s5257_s13  ;;  %s34_s10 = int_to_ptr.vmem [resolvable:$true] %s33_s10 }
   0x5   :  { %p5261_p1 = scmp.lt.u32.totalorder %s5257_s13, %s5608_s1 }
   0x7   :  { %p5263_p2 = pnand %p5261_p1, %p5258_p0 }
   0x9   :  { %5266 = shalt.err (!%p5263_p2)
}
   0xa   :  { %s5267_s18 = scalar_lea.vmem %s34_s10, 25088  ;;  %p5272_p4 = scmp.lt.s32.totalorder %s34_s10, %s34_s10 }
   0xb   :  { %p5268_p3 = scmp.ne.s32.totalorder %s34_s10, %s5267_s18  ;;  %p5273_p5 = scmp.lt.s32.totalorder %s5267_s18, %s5267_s18 }
   0xd   :  { %p5274_p6 = por %p5273_p5, %p5272_p4 }
   0xf   :  { %p5275_p7 = pnand %p5274_p6, %p5268_p3 }
  0x11   :  { %5278 = shalt.err (!%p5275_p7)
}
  0x12   :  { %s5398_s19 = smov 256   ;;  %s5399_s20 = smov 16  }
  0x13   :  { %39 = dma.hbm_to_vmem [thread:$0]  %s5608_s1, 25088, %s34_s10, [#allocation6], %s5398_s19, %s5398_s19, %s5399_s20  }
  0x14   :  { %s5400_s23 = smov [#allocation8]   ;;  %s5401_s25 = smov [#allocation2]  }
  0x15   :  { %s61_s24 = sshll.u32 %s5400_s23, 4  ;;  %s24_s26 = sshll.u32 %s5401_s25, 4  ;;  %s62_s24 = int_to_ptr.vmem [resolvable:$true] %s61_s24  ;;  %s25_s26 = int_to_ptr.vmem [resolvable:$true] %s24_s26 }
  0x16   :  { %s5279_s29 = scalar_lea.hbm %s5612_s5, 16384 }
  0x17   :  { %p5280_p8 = scmp.ne.s32.totalorder %s5612_s5, %s5279_s29  ;;  %p5283_p9 = scmp.lt.u32.totalorder %s5279_s29, %s5612_s5 }
  0x19   :  { %p5285_p10 = pnand %p5283_p9, %p5280_p8 }
  0x1b   :  { %5288 = shalt.err (!%p5285_p10)
}
  0x1c   :  { %s5289_s1 = scalar_lea.vmem %s62_s24, 16384  ;;  %p5294_p12 = scmp.lt.s32.totalorder %s62_s24, %s62_s24 }
  0x1d   :  { %p5290_p11 = scmp.ne.s32.totalorder %s62_s24, %s5289_s1  ;;  %p5295_p13 = scmp.lt.s32.totalorder %s5289_s1, %s5289_s1 }
  0x1f   :  { %p5296_p0 = por %p5295_p13, %p5294_p12 }
  0x21   :  { %p5297_p1 = pnand %p5296_p0, %p5290_p11 }
  0x23   :  { %5300 = shalt.err (!%p5297_p1)
}
  0x24   :  { %67 = dma.hbm_to_vmem [thread:$0]  %s5612_s5, 16384, %s62_s24, [#allocation9], %s5398_s19, %s5398_s19, %s5399_s20  }
  0x25   :  { %s5301_s17 = scalar_lea.hbm %s5607_s0, 448 }
  0x26   :  { %p5302_p2 = scmp.ne.s32.totalorder %s5607_s0, %s5301_s17  ;;  %p5305_p3 = scmp.lt.u32.totalorder %s5301_s17, %s5607_s0 }
  0x28   :  { %p5307_p4 = pnand %p5305_p3, %p5302_p2 }
  0x2a   :  { %5310 = shalt.err (!%p5307_p4)
}
  0x2b   :  { %s5311_s25 = scalar_lea.vmem %s25_s26, 448  ;;  %p5316_p6 = scmp.lt.s32.totalorder %s25_s26, %s25_s26 }
  0x2c   :  { %p5312_p5 = scmp.ne.s32.totalorder %s25_s26, %s5311_s25  ;;  %p5317_p7 = scmp.lt.s32.totalorder %s5311_s25, %s5311_s25 }
  0x2e   :  { %p5318_p8 = por %p5317_p7, %p5316_p6 }
  0x30   :  { %p5319_p9 = pnand %p5318_p8, %p5312_p5 }
  0x32   :  { %5322 = shalt.err (!%p5319_p9)
}
  0x33   :  { %27 = dma.hbm_to_vmem [thread:$0]  %s5607_s0, 448, %s25_s26, [#allocation3]  }
  0x34   :  { %s5402_s27 = smov [#allocation7]   ;;  %s5403_s29 = smov [#allocation10]  }
  0x35   :  { %s47_s28 = sshll.u32 %s5402_s27, 4  ;;  %s75_s30 = sshll.u32 %s5403_s29, 4  ;;  %s48_s28 = int_to_ptr.vmem [resolvable:$true] %s47_s28  ;;  %s76_s30 = int_to_ptr.vmem [resolvable:$true] %s75_s30 }
  0x36   :  { %s5323_s13 = scalar_lea.hbm %s5610_s3, 16384 }
  0x37   :  { %p5324_p10 = scmp.ne.s32.totalorder %s5610_s3, %s5323_s13  ;;  %p5327_p11 = scmp.lt.u32.totalorder %s5323_s13, %s5610_s3 }
  0x39   :  { %p5329_p12 = pnand %p5327_p11, %p5324_p10 }
  0x3b   :  { %5332 = shalt.err (!%p5329_p12)
}
  0x3c   :  { %s5333_s0 = scalar_lea.vmem %s48_s28, 16384  ;;  %p5338_p0 = scmp.lt.s32.totalorder %s48_s28, %s48_s28 }
  0x3d   :  { %p5334_p13 = scmp.ne.s32.totalorder %s48_s28, %s5333_s0  ;;  %p5339_p1 = scmp.lt.s32.totalorder %s5333_s0, %s5333_s0 }
  0x3f   :  { %p5340_p2 = por %p5339_p1, %p5338_p0 }
  0x41   :  { %p5341_p3 = pnand %p5340_p2, %p5334_p13 }
  0x43   :  { %5344 = shalt.err (!%p5341_p3)
}
  0x44   :  { %53 = dma.hbm_to_vmem [thread:$0]  %s5610_s3, 16384, %s48_s28, [#allocation6], %s5398_s19, %s5398_s19, %s5399_s20  }
  0x45   :  { %s5345_s21 = scalar_lea.hbm %s5614_s7, 4096 }
  0x46   :  { %p5346_p4 = scmp.ne.s32.totalorder %s5614_s7, %s5345_s21  ;;  %p5349_p5 = scmp.lt.u32.totalorder %s5345_s21, %s5614_s7 }
  0x48   :  { %p5351_p6 = pnand %p5349_p5, %p5346_p4 }
  0x4a   :  { %5354 = shalt.err (!%p5351_p6)
}
  0x4b   :  { %s5355_s24 = scalar_lea.vmem %s76_s30, 4096  ;;  %p5360_p8 = scmp.lt.s32.totalorder %s76_s30, %s76_s30 }
  0x4c   :  { %p5356_p7 = scmp.ne.s32.totalorder %s76_s30, %s5355_s24  ;;  %p5361_p9 = scmp.lt.s32.totalorder %s5355_s24, %s5355_s24 }
  0x4e   :  { %p5362_p10 = por %p5361_p9, %p5360_p8 }
  0x50   :  { %p5363_p11 = pnand %p5362_p10, %p5356_p7 }
  0x52   :  { %5366 = shalt.err (!%p5363_p11)
}
  0x53   :  { %s5404_s3 = smov 64   ;;  %s5405_s19 = smov 4  }
  0x54   :  { %81 = dma.hbm_to_vmem [thread:$0]  %s5614_s7, 4096, %s76_s30, [#allocation9], %s5404_s3, %s5404_s3, %s5405_s19  }
  0x55   :  { %5389 = dma.done.wait [#allocation3], 448  }
  0x56   :  { %5390 = vsyncadd [#allocation3], 4294966848 }
  0x57   :  { %5391 = dma.done.wait [#allocation6], 41472  }
  0x58   :  { %5392 = vsyncadd [#allocation6], 4294925824 }
  0x59   :  { %5393 = dma.done.wait [#allocation9], 20480  }
  0x5a   :  { %5394 = vsyncadd [#allocation9], 4294946816  ;;  %v4540_v0 = vld [vmem:[#allocation5 + $0x4] ss:$16 sps:$4 sm:$0xff]   ;;  %v4542_v1 = vld [vmem:[#allocation5 + $0xc] ss:$16 sps:$4 sm:$0xff]  }
  0x5b   :  { %1330 = vmatprep.subr.bf16.mxu0 %v4540_v0  ;;  %v4544_v2 = vld [vmem:[#allocation5] ss:$16 sps:$4 sm:$0xff]   ;;  %v4545_v3 = vld [vmem:[#allocation5 + $0x8] ss:$16 sps:$4 sm:$0xff]   ;;  %1494 = vmatprep.subr.bf16.mxu1 %v4542_v1  ;;  %v4546_v4 = vld [vmem:[#allocation5 + $0x24] ss:$16 sps:$4 sm:$0xff]  }
  0x5c   :  { %1331 = vmatpush1.bf16.msra.mxu0 %v4544_v2  ;;  %1495 = vmatpush1.bf16.msra.mxu1 %v4545_v3  ;;  %v4548_v5 = vld [vmem:[#allocation5 + $0x2c] ss:$16 sps:$4 sm:$0xff]   ;;  %v4550_v6 = vld [vmem:[#allocation5 + $0x20] ss:$16 sps:$4 sm:$0xff]   ;;  %v4551_v7 = vld [vmem:[#allocation5 + $0x28] ss:$16 sps:$4 sm:$0xff]  }
  0x5d   :  { %1332 = vmatprep.subr.bf16.mxu0 %v4546_v4  ;;  %1496 = vmatprep.subr.bf16.mxu1 %v4548_v5  ;;  %v4552_v8 = vld [vmem:[#allocation5 + $0x44] ss:$16 sps:$4 sm:$0xff]   ;;  %v4554_v9 = vld [vmem:[#allocation5 + $0x4c] ss:$16 sps:$4 sm:$0xff]   ;;  %v4556_v10 = vld [vmem:[#allocation5 + $0x40] ss:$16 sps:$4 sm:$0xff]  }
  0x5e   :  { %v4557_v11 = vld [vmem:[#allocation5 + $0x48] ss:$16 sps:$4 sm:$0xff]   ;;  %v4558_v12 = vld [vmem:[#allocation5 + $0x64] ss:$16 sps:$4 sm:$0xff]   ;;  %v4560_v13 = vld [vmem:[#allocation5 + $0x6c] ss:$16 sps:$4 sm:$0xff]  }
  0x5f   :  { %v4562_v14 = vld [vmem:[#allocation5 + $0x60] ss:$16 sps:$4 sm:$0xff]   ;;  %v4563_v15 = vld [vmem:[#allocation5 + $0x68] ss:$16 sps:$4 sm:$0xff]   ;;  %v4564_v16 = vld [vmem:[#allocation5 + $0x84] ss:$16 sps:$4 sm:$0xff]  }
  0x60   :  { %1333 = vmatpush1.bf16.msra.mxu0 %v4550_v6  ;;  %1497 = vmatpush1.bf16.msra.mxu1 %v4551_v7  ;;  %v4566_v17 = vld [vmem:[#allocation5 + $0x8c] ss:$16 sps:$4 sm:$0xff]   ;;  %v4568_v18 = vld [vmem:[#allocation5 + $0x80] ss:$16 sps:$4 sm:$0xff]   ;;  %v4569_v19 = vld [vmem:[#allocation5 + $0x88] ss:$16 sps:$4 sm:$0xff]  }
  0x61   :  { %1334 = vmatprep.subr.bf16.mxu0 %v4552_v8  ;;  %1498 = vmatprep.subr.bf16.mxu1 %v4554_v9  ;;  %v4570_v20 = vld [vmem:[#allocation5 + $0xa4] ss:$16 sps:$4 sm:$0xff]   ;;  %v4572_v21 = vld [vmem:[#allocation5 + $0xac] ss:$16 sps:$4 sm:$0xff]   ;;  %v4574_v22 = vld [vmem:[#allocation5 + $0xa0] ss:$16 sps:$4 sm:$0xff]  }
  0x62   :  { %v4575_v23 = vld [vmem:[#allocation5 + $0xa8] ss:$16 sps:$4 sm:$0xff]   ;;  %v4576_v24 = vld [vmem:[#allocation5 + $0xc4] ss:$16 sps:$4 sm:$0xff]   ;;  %v4578_v25 = vld [vmem:[#allocation5 + $0xcc] ss:$16 sps:$4 sm:$0xff]  }
  0x63   :  { %v4580_v26 = vld [vmem:[#allocation5 + $0xc0] ss:$16 sps:$4 sm:$0xff]   ;;  %v4581_v27 = vld [vmem:[#allocation5 + $0xc8] ss:$16 sps:$4 sm:$0xff]   ;;  %v4582_v28 = vld [vmem:[#allocation5 + $0xe4] ss:$16 sps:$4 sm:$0xff]  }
  0x64   :  { %1335 = vmatpush1.bf16.msra.mxu0 %v4556_v10  ;;  %1499 = vmatpush1.bf16.msra.mxu1 %v4557_v11  ;;  %v4584_v29 = vld [vmem:[#allocation5 + $0xec] ss:$16 sps:$4 sm:$0xff]   ;;  %v4586_v30 = vld [vmem:[#allocation5 + $0xe0] ss:$16 sps:$4 sm:$0xff]   ;;  %v4587_v31 = vld [vmem:[#allocation5 + $0xe8] ss:$16 sps:$4 sm:$0xff]  }
  0x65   :  { %1336 = vmatprep.subr.bf16.mxu0 %v4558_v12  ;;  %1500 = vmatprep.subr.bf16.mxu1 %v4560_v13  ;;  %v4588_v32 = vld [vmem:[#allocation5 + $0x104] ss:$16 sps:$4 sm:$0xff]   ;;  %v4590_v33 = vld [vmem:[#allocation5 + $0x10c] ss:$16 sps:$4 sm:$0xff]   ;;  %v4592_v34 = vld [vmem:[#allocation5 + $0x100] ss:$16 sps:$4 sm:$0xff]  }
  0x66   :  { %v4593_v35 = vld [vmem:[#allocation5 + $0x108] ss:$16 sps:$4 sm:$0xff]   ;;  %v4594_v36 = vld [vmem:[#allocation5 + $0x124] ss:$16 sps:$4 sm:$0xff]   ;;  %v4596_v37 = vld [vmem:[#allocation5 + $0x12c] ss:$16 sps:$4 sm:$0xff]  }
  0x67   :  { %v4598_v38 = vld [vmem:[#allocation5 + $0x120] ss:$16 sps:$4 sm:$0xff]   ;;  %v4599_v39 = vld [vmem:[#allocation5 + $0x128] ss:$16 sps:$4 sm:$0xff]   ;;  %v4600_v40 = vld [vmem:[#allocation5 + $0x144] ss:$16 sps:$4 sm:$0xff]  }
  0x68   :  { %1337 = vmatpush1.bf16.msra.mxu0 %v4562_v14  ;;  %1501 = vmatpush1.bf16.msra.mxu1 %v4563_v15  ;;  %v4602_v41 = vld [vmem:[#allocation5 + $0x14c] ss:$16 sps:$4 sm:$0xff]   ;;  %v4604_v42 = vld [vmem:[#allocation5 + $0x140] ss:$16 sps:$4 sm:$0xff]   ;;  %v4605_v43 = vld [vmem:[#allocation5 + $0x148] ss:$16 sps:$4 sm:$0xff]  }
  0x69   :  { %1338 = vmatprep.subr.bf16.mxu0 %v4564_v16  ;;  %1502 = vmatprep.subr.bf16.mxu1 %v4566_v17  ;;  %v4606_v44 = vld [vmem:[#allocation5 + $0x164] ss:$16 sps:$4 sm:$0xff]   ;;  %v4608_v45 = vld [vmem:[#allocation5 + $0x16c] ss:$16 sps:$4 sm:$0xff]   ;;  %v4610_v47 = vld [vmem:[#allocation5 + $0x160] ss:$16 sps:$4 sm:$0xff]  }
  0x6a   :  { %v100_v46 = vld [vmem:[#allocation2] sm:$0xff]  ;;  %v4614_v51 = vld [vmem:[#allocation5 + $0x18c] ss:$16 sps:$4 sm:$0xff]   ;;  %v4616_v52 = vld [vmem:[#allocation5 + $0x180] ss:$16 sps:$4 sm:$0xff]   ;;  %vm1326_vm0 = vcmask 130048  }
  0x6b   :  { %v3940_v48 = vcombine.high %v100_v46, %v100_v46  ;;  %v4611_v49 = vld [vmem:[#allocation5 + $0x168] ss:$16 sps:$4 sm:$0xff]   ;;  %v4612_v50 = vld [vmem:[#allocation5 + $0x184] ss:$16 sps:$4 sm:$0xff]   ;;  %v4620_v55 = vld [vmem:[#allocation5 + $0x1ac] ss:$16 sps:$4 sm:$0xff]   ;;  %v3939_v4 = vcombine.low %v100_v46, %v100_v46 }
  0x6c   :  { %1339 = vmatpush1.bf16.msra.mxu0 %v4568_v18  ;;  %1503 = vmatpush1.bf16.msra.mxu1 %v4569_v19  ;;  %v4617_v53 = vld [vmem:[#allocation5 + $0x188] ss:$16 sps:$4 sm:$0xff]   ;;  %v4618_v54 = vld [vmem:[#allocation5 + $0x1a4] ss:$16 sps:$4 sm:$0xff]   ;;  %v4622_v56 = vld [vmem:[#allocation5 + $0x1a0] ss:$16 sps:$4 sm:$0xff]  }
  0x6d   :  { %1340 = vmatprep.subr.bf16.mxu0 %v4570_v20  ;;  %1504 = vmatprep.subr.bf16.mxu1 %v4572_v21  ;;  %v4623_v57 = vld [vmem:[#allocation5 + $0x1a8] ss:$16 sps:$4 sm:$0xff]   ;;  %v4624_v58 = vld [vmem:[#allocation5 + $0x1c4] ss:$16 sps:$4 sm:$0xff]   ;;  %v4626_v59 = vld [vmem:[#allocation5 + $0x1cc] ss:$16 sps:$4 sm:$0xff]  }
  0x6e   :  { %1362 = vmatprep.mubr.bf16.mxu0 %v3940_v48  ;;  %1526 = vmatprep.mubr.bf16.mxu1 %v3940_v48  ;;  %v4628_v60 = vld [vmem:[#allocation5 + $0x1c0] ss:$16 sps:$4 sm:$0xff]   ;;  %v4629_v61 = vld [vmem:[#allocation5 + $0x1c8] ss:$16 sps:$4 sm:$0xff]   ;;  %v4630_v62 = vld [vmem:[#allocation5 + $0x1e4] ss:$16 sps:$4 sm:$0xff]  }
  0x6f   :  { %v4632_v63 = vld [vmem:[#allocation5 + $0x1ec] ss:$16 sps:$4 sm:$0xff]   ;;  %v4634_v0 = vld [vmem:[#allocation5 + $0x1e0] ss:$16 sps:$4 sm:$0xff]   ;;  %v4635_v1 = vld [vmem:[#allocation5 + $0x1e8] ss:$16 sps:$4 sm:$0xff]  }
  0x70   :  { %1341 = vmatpush1.bf16.msra.mxu0 %v4574_v22  ;;  %1505 = vmatpush1.bf16.msra.mxu1 %v4575_v23  ;;  %v4640_v2 = vld [vmem:[#allocation5 + $0x204] ss:$16 sps:$4 sm:$0xff]   ;;  %v4643_v3 = vld [vmem:[#allocation5 + $0x20c] ss:$16 sps:$4 sm:$0xff]   ;;  %v4638_v5 = vld [vmem:[#allocation5 + $0x200] ss:$16 sps:$4 sm:$0xff]  }
  0x71   :  { %1342 = vmatprep.subr.bf16.mxu0 %v4576_v24  ;;  %1506 = vmatprep.subr.bf16.mxu1 %v4578_v25  ;;  %v4641_v6 = vld [vmem:[#allocation5 + $0x208] ss:$16 sps:$4 sm:$0xff]   ;;  %v4646_v7 = vld [vmem:[#allocation5 + $0x224] ss:$16 sps:$4 sm:$0xff]   ;;  %v4649_v8 = vld [vmem:[#allocation5 + $0x22c] ss:$16 sps:$4 sm:$0xff]  }
  0x72   :  { %v4644_v9 = vld [vmem:[#allocation5 + $0x220] ss:$16 sps:$4 sm:$0xff]   ;;  %v4647_v10 = vld [vmem:[#allocation5 + $0x228] ss:$16 sps:$4 sm:$0xff]   ;;  %v4652_v11 = vld [vmem:[#allocation5 + $0x244] ss:$16 sps:$4 sm:$0xff]  }
  0x73   :  { %v4655_v12 = vld [vmem:[#allocation5 + $0x24c] ss:$16 sps:$4 sm:$0xff]   ;;  %v4650_v13 = vld [vmem:[#allocation5 + $0x240] ss:$16 sps:$4 sm:$0xff]   ;;  %v4653_v14 = vld [vmem:[#allocation5 + $0x248] ss:$16 sps:$4 sm:$0xff]  }
  0x74   :  { %1343 = vmatpush1.bf16.msra.mxu0 %v4580_v26  ;;  %1507 = vmatpush1.bf16.msra.mxu1 %v4581_v27  ;;  %v4658_v15 = vld [vmem:[#allocation5 + $0x264] ss:$16 sps:$4 sm:$0xff]   ;;  %v4661_v16 = vld [vmem:[#allocation5 + $0x26c] ss:$16 sps:$4 sm:$0xff]   ;;  %v4656_v17 = vld [vmem:[#allocation5 + $0x260] ss:$16 sps:$4 sm:$0xff]  }
  0x75   :  { %1344 = vmatprep.subr.bf16.mxu0 %v4582_v28  ;;  %1508 = vmatprep.subr.bf16.mxu1 %v4584_v29  ;;  %v4659_v18 = vld [vmem:[#allocation5 + $0x268] ss:$16 sps:$4 sm:$0xff]   ;;  %v4664_v19 = vld [vmem:[#allocation5 + $0x284] ss:$16 sps:$4 sm:$0xff]   ;;  %v4667_v20 = vld [vmem:[#allocation5 + $0x28c] ss:$16 sps:$4 sm:$0xff]  }
  0x76   :  { %v4662_v21 = vld [vmem:[#allocation5 + $0x280] ss:$16 sps:$4 sm:$0xff]   ;;  %v4665_v22 = vld [vmem:[#allocation5 + $0x288] ss:$16 sps:$4 sm:$0xff]   ;;  %v4670_v23 = vld [vmem:[#allocation5 + $0x2a4] ss:$16 sps:$4 sm:$0xff]  }
  0x77   :  { %v4673_v24 = vld [vmem:[#allocation5 + $0x2ac] ss:$16 sps:$4 sm:$0xff]   ;;  %v4668_v25 = vld [vmem:[#allocation5 + $0x2a0] ss:$16 sps:$4 sm:$0xff]   ;;  %v4671_v26 = vld [vmem:[#allocation5 + $0x2a8] ss:$16 sps:$4 sm:$0xff]  }
  0x78   :  { %1345 = vmatpush1.bf16.msra.mxu0 %v4586_v30  ;;  %1509 = vmatpush1.bf16.msra.mxu1 %v4587_v31  ;;  %v4676_v27 = vld [vmem:[#allocation5 + $0x2c4] ss:$16 sps:$4 sm:$0xff]   ;;  %v4679_v28 = vld [vmem:[#allocation5 + $0x2cc] ss:$16 sps:$4 sm:$0xff]   ;;  %v4674_v31 = vld [vmem:[#allocation5 + $0x2c0] ss:$16 sps:$4 sm:$0xff]  }
  0x79   :  { %1346 = vmatprep.subr.bf16.mxu0 %v4588_v32  ;;  %1510 = vmatprep.subr.bf16.mxu1 %v4590_v33  ;;  %v5527_v29 = vld [vmem:[#allocation2 + $0x8] sm:$0xff]  ;;  %v4677_v32 = vld [vmem:[#allocation5 + $0x2c8] ss:$16 sps:$4 sm:$0xff]   ;;  %v4682_v33 = vld [vmem:[#allocation5 + $0x2e4] ss:$16 sps:$4 sm:$0xff]   ;;  %s5407_s12 = smov [#allocation11]  }
  0x7a   :  { %v3942_v30 = vcombine.high %v5527_v29, %v5527_v29  ;;  %v4703_v46 = vld [vmem:[#allocation5 + $0x34c] ss:$16 sps:$4 sm:$0xff]   ;;  %v4701_v48 = vld [vmem:[#allocation5 + $0x348] ss:$16 sps:$4 sm:$0xff]   ;;  %s3928_s13 = sshll.u32 %s5407_s12, 4  ;;  %s3929_s13 = int_to_ptr.vmem [resolvable:$true] %s3928_s13 }
  0x7b   :  { %s5367_s1 = scalar_lea.vmem %s3929_s13, 128  ;;  %p5372_p13 = scmp.lt.s32.totalorder %s3929_s13, %s3929_s13 }
  0x7c   :  { %1347 = vmatpush1.bf16.msra.mxu0 %v4592_v34  ;;  %1511 = vmatpush1.bf16.msra.mxu1 %v4593_v35  ;;  %v4685_v34 = vld [vmem:[#allocation5 + $0x2ec] ss:$16 sps:$4 sm:$0xff]   ;;  %v4680_v35 = vld [vmem:[#allocation5 + $0x2e0] ss:$16 sps:$4 sm:$0xff]   ;;  %p5368_p12 = scmp.ne.s32.totalorder %s3929_s13, %s5367_s1  ;;  %p5373_p0 = scmp.lt.s32.totalorder %s5367_s1, %s5367_s1 }
  0x7d   :  { %1348 = vmatprep.subr.bf16.mxu0 %v4594_v36  ;;  %1512 = vmatprep.subr.bf16.mxu1 %v4596_v37  ;;  %v4683_v36 = vld [vmem:[#allocation5 + $0x2e8] ss:$16 sps:$4 sm:$0xff]   ;;  %v4688_v37 = vld [vmem:[#allocation5 + $0x304] ss:$16 sps:$4 sm:$0xff]  }
  0x7e   :  { %p5374_p1 = por %p5373_p0, %p5372_p13 }
  0x80   :  { %1349 = vmatpush1.bf16.msra.mxu0 %v4598_v38  ;;  %1513 = vmatpush1.bf16.msra.mxu1 %v4599_v39  ;;  %v4691_v38 = vld [vmem:[#allocation5 + $0x30c] ss:$16 sps:$4 sm:$0xff]   ;;  %v4686_v39 = vld [vmem:[#allocation5 + $0x300] ss:$16 sps:$4 sm:$0xff]   ;;  %p5375_p2 = pnand %p5374_p1, %p5368_p12 }
  0x81   :  { %1350 = vmatprep.subr.bf16.mxu0 %v4600_v40  ;;  %1514 = vmatprep.subr.bf16.mxu1 %v4602_v41  ;;  %v4689_v40 = vld [vmem:[#allocation5 + $0x308] ss:$16 sps:$4 sm:$0xff]   ;;  %v4694_v41 = vld [vmem:[#allocation5 + $0x324] ss:$16 sps:$4 sm:$0xff]  }
  0x84   :  { %1351 = vmatpush1.bf16.msra.mxu0 %v4604_v42  ;;  %1515 = vmatpush1.bf16.msra.mxu1 %v4605_v43  ;;  %v4697_v42 = vld [vmem:[#allocation5 + $0x32c] ss:$16 sps:$4 sm:$0xff]   ;;  %v4692_v43 = vld [vmem:[#allocation5 + $0x320] ss:$16 sps:$4 sm:$0xff]  }
  0x85   :  { %1352 = vmatprep.subr.bf16.mxu0 %v4606_v44  ;;  %1516 = vmatprep.subr.bf16.mxu1 %v4608_v45  ;;  %v4695_v44 = vld [vmem:[#allocation5 + $0x328] ss:$16 sps:$4 sm:$0xff]   ;;  %v4700_v45 = vld [vmem:[#allocation5 + $0x344] ss:$16 sps:$4 sm:$0xff]  }
  0x88   :  { %1353 = vmatpush1.bf16.msra.mxu0 %v4610_v47  ;;  %1517 = vmatpush1.bf16.msra.mxu1 %v4611_v49  ;;  %v4698_v47 = vld [vmem:[#allocation5 + $0x340] ss:$16 sps:$4 sm:$0xff]   ;;  %v4706_v49 = vld [vmem:[#allocation5 + $0x364] ss:$16 sps:$4 sm:$0xff]  }
  0x89   :  { %1354 = vmatprep.subr.bf16.mxu0 %v4612_v50  ;;  %1518 = vmatprep.subr.bf16.mxu1 %v4614_v51  ;;  %v4709_v50 = vld [vmem:[#allocation5 + $0x36c] ss:$16 sps:$4 sm:$0xff]   ;;  %v4704_v51 = vld [vmem:[#allocation5 + $0x360] ss:$16 sps:$4 sm:$0xff]  }
  0x8c   :  { %1355 = vmatpush1.bf16.msra.mxu0 %v4616_v52  ;;  %1519 = vmatpush1.bf16.msra.mxu1 %v4617_v53  ;;  %v4707_v52 = vld [vmem:[#allocation5 + $0x368] ss:$16 sps:$4 sm:$0xff]   ;;  %v4712_v53 = vld [vmem:[#allocation5 + $0x384] ss:$16 sps:$4 sm:$0xff]  }
  0x8d   :  { %1356 = vmatprep.subr.bf16.mxu0 %v4618_v54  ;;  %1520 = vmatprep.subr.bf16.mxu1 %v4620_v55  ;;  %v4715_v54 = vld [vmem:[#allocation5 + $0x38c] ss:$16 sps:$4 sm:$0xff]   ;;  %v4710_v55 = vld [vmem:[#allocation5 + $0x380] ss:$16 sps:$4 sm:$0xff]  }
  0x90   :  { %1357 = vmatpush1.bf16.msra.mxu0 %v4622_v56  ;;  %1521 = vmatpush1.bf16.msra.mxu1 %v4623_v57  ;;  %v4713_v56 = vld [vmem:[#allocation5 + $0x388] ss:$16 sps:$4 sm:$0xff]   ;;  %v4718_v57 = vld [vmem:[#allocation5 + $0x3a4] ss:$16 sps:$4 sm:$0xff]  }
  0x91   :  { %1358 = vmatprep.subr.bf16.mxu0 %v4624_v58  ;;  %1522 = vmatprep.subr.bf16.mxu1 %v4626_v59  ;;  %v4721_v58 = vld [vmem:[#allocation5 + $0x3ac] ss:$16 sps:$4 sm:$0xff]   ;;  %v4716_v59 = vld [vmem:[#allocation5 + $0x3a0] ss:$16 sps:$4 sm:$0xff]  }
  0x94   :  { %1359 = vmatpush1.bf16.msra.mxu0 %v4628_v60  ;;  %1523 = vmatpush1.bf16.msra.mxu1 %v4629_v61  ;;  %v4719_v60 = vld [vmem:[#allocation5 + $0x3a8] ss:$16 sps:$4 sm:$0xff]   ;;  %v4724_v61 = vld [vmem:[#allocation5 + $0x3c4] ss:$16 sps:$4 sm:$0xff]  }
  0x95   :  { %1360 = vmatprep.subr.bf16.mxu0 %v4630_v62  ;;  %1524 = vmatprep.subr.bf16.mxu1 %v4632_v63  ;;  %v4727_v62 = vld [vmem:[#allocation5 + $0x3cc] ss:$16 sps:$4 sm:$0xff]   ;;  %v4722_v63 = vld [vmem:[#allocation5 + $0x3c0] ss:$16 sps:$4 sm:$0xff]  }
  0x98   :  { %1361 = vmatpush1.bf16.msra.mxu0 %v4634_v0  ;;  %1525 = vmatpush1.bf16.msra.mxu1 %v4635_v1  ;;  %v4725_v0 = vld [vmem:[#allocation5 + $0x3c8] ss:$16 sps:$4 sm:$0xff]   ;;  %v4730_v1 = vld [vmem:[#allocation5 + $0x3e4] ss:$16 sps:$4 sm:$0xff]  }
  0x99   :  { %1371 = vmatprep.subr.bf16.mxu0 %v4640_v2  ;;  %1535 = vmatprep.subr.bf16.mxu1 %v4643_v3  ;;  %v4733_v2 = vld [vmem:[#allocation5 + $0x3ec] ss:$16 sps:$4 sm:$0xff]   ;;  %v4728_v3 = vld [vmem:[#allocation5 + $0x3e0] ss:$16 sps:$4 sm:$0xff]  }
  0x9b   :  { %1363 = vmatmul.mubr.bf16.vlgmr.msra.gmra.mrb[0].mxu0 %v3939_v4  ;;  %1527 = vmatmul.mubr.bf16.vlgmr.msra.gmra.mrb[0].mxu1 %v3939_v4  ;;  %v4731_v4 = vld [vmem:[#allocation5 + $0x3e8] ss:$16 sps:$4 sm:$0xff]  }
  0x9c   :  { %1372 = vmatpush1.bf16.msra.mxu0 %v4638_v5  ;;  %1536 = vmatpush1.bf16.msra.mxu1 %v4641_v6  ;;  %v4738_v5 = vld [vmem:[#allocation5 + $0x404] ss:$16 sps:$4 sm:$0xff]   ;;  %v4741_v6 = vld [vmem:[#allocation5 + $0x40c] ss:$16 sps:$4 sm:$0xff]  }
  0x9d   :  { %1373 = vmatprep.subr.bf16.mxu0 %v4646_v7  ;;  %1537 = vmatprep.subr.bf16.mxu1 %v4649_v8  ;;  %v3941_v7 = vcombine.low %v5527_v29, %v5527_v29  ;;  %v4736_v8 = vld [vmem:[#allocation5 + $0x400] ss:$16 sps:$4 sm:$0xff]   ;;  %v4771_v29 = vld [vmem:[#allocation5 + $0x4ac] ss:$16 sps:$4 sm:$0xff]  }
  0x9e   :  { %1403 = vmatprep.mubr.bf16.mxu0 %v3942_v30  ;;  %1567 = vmatprep.mubr.bf16.mxu1 %v3942_v30  ;;  %v4766_v30 = vld [vmem:[#allocation5 + $0x4a0] ss:$16 sps:$4 sm:$0xff]  }
  0xa0   :  { %1374 = vmatpush1.bf16.msra.mxu0 %v4644_v9  ;;  %1538 = vmatpush1.bf16.msra.mxu1 %v4647_v10  ;;  %v4739_v9 = vld [vmem:[#allocation5 + $0x408] ss:$16 sps:$4 sm:$0xff]   ;;  %v4744_v10 = vld [vmem:[#allocation5 + $0x424] ss:$16 sps:$4 sm:$0xff]  }
  0xa1   :  { %1375 = vmatprep.subr.bf16.mxu0 %v4652_v11  ;;  %1539 = vmatprep.subr.bf16.mxu1 %v4655_v12  ;;  %v5533_v11 = vld [vmem:[#allocation2 + $0x10] sm:$0xff]  ;;  %v4747_v12 = vld [vmem:[#allocation5 + $0x42c] ss:$16 sps:$4 sm:$0xff]  }
  0xa4   :  { %1376 = vmatpush1.bf16.msra.mxu0 %v4650_v13  ;;  %1540 = vmatpush1.bf16.msra.mxu1 %v4653_v14  ;;  %v3944_v13 = vcombine.high %v5533_v11, %v5533_v11  ;;  %v4742_v14 = vld [vmem:[#allocation5 + $0x420] ss:$16 sps:$4 sm:$0xff]  }
  0xa5   :  { %1377 = vmatprep.subr.bf16.mxu0 %v4658_v15  ;;  %1541 = vmatprep.subr.bf16.mxu1 %v4661_v16  ;;  %v4745_v15 = vld [vmem:[#allocation5 + $0x428] ss:$16 sps:$4 sm:$0xff]   ;;  %v4750_v16 = vld [vmem:[#allocation5 + $0x444] ss:$16 sps:$4 sm:$0xff]  }
  0xa8   :  { %1378 = vmatpush1.bf16.msra.mxu0 %v4656_v17  ;;  %1542 = vmatpush1.bf16.msra.mxu1 %v4659_v18  ;;  %v4753_v17 = vld [vmem:[#allocation5 + $0x44c] ss:$16 sps:$4 sm:$0xff]   ;;  %v4748_v18 = vld [vmem:[#allocation5 + $0x440] ss:$16 sps:$4 sm:$0xff]  }
  0xa9   :  { %1379 = vmatprep.subr.bf16.mxu0 %v4664_v19  ;;  %1543 = vmatprep.subr.bf16.mxu1 %v4667_v20  ;;  %v4751_v19 = vld [vmem:[#allocation5 + $0x448] ss:$16 sps:$4 sm:$0xff]   ;;  %v4756_v20 = vld [vmem:[#allocation5 + $0x464] ss:$16 sps:$4 sm:$0xff]  }
  0xac   :  { %1380 = vmatpush1.bf16.msra.mxu0 %v4662_v21  ;;  %1544 = vmatpush1.bf16.msra.mxu1 %v4665_v22  ;;  %v4759_v21 = vld [vmem:[#allocation5 + $0x46c] ss:$16 sps:$4 sm:$0xff]   ;;  %v4754_v22 = vld [vmem:[#allocation5 + $0x460] ss:$16 sps:$4 sm:$0xff]  }
  0xad   :  { %1381 = vmatprep.subr.bf16.mxu0 %v4670_v23  ;;  %1545 = vmatprep.subr.bf16.mxu1 %v4673_v24  ;;  %v4757_v23 = vld [vmem:[#allocation5 + $0x468] ss:$16 sps:$4 sm:$0xff]   ;;  %v4762_v24 = vld [vmem:[#allocation5 + $0x484] ss:$16 sps:$4 sm:$0xff]  }
  0xb0   :  { %1382 = vmatpush1.bf16.msra.mxu0 %v4668_v25  ;;  %1546 = vmatpush1.bf16.msra.mxu1 %v4671_v26  ;;  %v4765_v25 = vld [vmem:[#allocation5 + $0x48c] ss:$16 sps:$4 sm:$0xff]   ;;  %v4760_v26 = vld [vmem:[#allocation5 + $0x480] ss:$16 sps:$4 sm:$0xff]  }
  0xb1   :  { %1383 = vmatprep.subr.bf16.mxu0 %v4676_v27  ;;  %1547 = vmatprep.subr.bf16.mxu1 %v4679_v28  ;;  %v4763_v27 = vld [vmem:[#allocation5 + $0x488] ss:$16 sps:$4 sm:$0xff]   ;;  %v4768_v28 = vld [vmem:[#allocation5 + $0x4a4] ss:$16 sps:$4 sm:$0xff]  }
  0xb4   :  { %1384 = vmatpush1.bf16.msra.mxu0 %v4674_v31  ;;  %1548 = vmatpush1.bf16.msra.mxu1 %v4677_v32  ;;  %v4769_v31 = vld [vmem:[#allocation5 + $0x4a8] ss:$16 sps:$4 sm:$0xff]   ;;  %v4774_v32 = vld [vmem:[#allocation5 + $0x4c4] ss:$16 sps:$4 sm:$0xff]  }
  0xb5   :  { %1385 = vmatprep.subr.bf16.mxu0 %v4682_v33  ;;  %1549 = vmatprep.subr.bf16.mxu1 %v4685_v34  ;;  %v4777_v33 = vld [vmem:[#allocation5 + $0x4cc] ss:$16 sps:$4 sm:$0xff]   ;;  %v4772_v34 = vld [vmem:[#allocation5 + $0x4c0] ss:$16 sps:$4 sm:$0xff]  }
  0xb8   :  { %1386 = vmatpush1.bf16.msra.mxu0 %v4680_v35  ;;  %1550 = vmatpush1.bf16.msra.mxu1 %v4683_v36  ;;  %v4775_v35 = vld [vmem:[#allocation5 + $0x4c8] ss:$16 sps:$4 sm:$0xff]   ;;  %v4780_v36 = vld [vmem:[#allocation5 + $0x4e4] ss:$16 sps:$4 sm:$0xff]  }
  0xb9   :  { %1387 = vmatprep.subr.bf16.mxu0 %v4688_v37  ;;  %1551 = vmatprep.subr.bf16.mxu1 %v4691_v38  ;;  %v4783_v37 = vld [vmem:[#allocation5 + $0x4ec] ss:$16 sps:$4 sm:$0xff]   ;;  %v4778_v38 = vld [vmem:[#allocation5 + $0x4e0] ss:$16 sps:$4 sm:$0xff]  }
  0xbc   :  { %1388 = vmatpush1.bf16.msra.mxu0 %v4686_v39  ;;  %1552 = vmatpush1.bf16.msra.mxu1 %v4689_v40  ;;  %v4781_v39 = vld [vmem:[#allocation5 + $0x4e8] ss:$16 sps:$4 sm:$0xff]   ;;  %v4786_v40 = vld [vmem:[#allocation5 + $0x504] ss:$16 sps:$4 sm:$0xff]  }
  0xbd   :  { %1389 = vmatprep.subr.bf16.mxu0 %v4694_v41  ;;  %1553 = vmatprep.subr.bf16.mxu1 %v4697_v42  ;;  %v4789_v41 = vld [vmem:[#allocation5 + $0x50c] ss:$16 sps:$4 sm:$0xff]   ;;  %v4784_v42 = vld [vmem:[#allocation5 + $0x500] ss:$16 sps:$4 sm:$0xff]  }
  0xc0   :  { %1390 = vmatpush1.bf16.msra.mxu0 %v4692_v43  ;;  %1554 = vmatpush1.bf16.msra.mxu1 %v4695_v44  ;;  %v4787_v43 = vld [vmem:[#allocation5 + $0x508] ss:$16 sps:$4 sm:$0xff]   ;;  %v4792_v44 = vld [vmem:[#allocation5 + $0x524] ss:$16 sps:$4 sm:$0xff]  }
  0xc1   :  { %1391 = vmatprep.subr.bf16.mxu0 %v4700_v45  ;;  %1555 = vmatprep.subr.bf16.mxu1 %v4703_v46  ;;  %v4795_v45 = vld [vmem:[#allocation5 + $0x52c] ss:$16 sps:$4 sm:$0xff]   ;;  %v4790_v46 = vld [vmem:[#allocation5 + $0x520] ss:$16 sps:$4 sm:$0xff]  }
  0xc4   :  { %1392 = vmatpush1.bf16.msra.mxu0 %v4698_v47  ;;  %1556 = vmatpush1.bf16.msra.mxu1 %v4701_v48  ;;  %v4793_v47 = vld [vmem:[#allocation5 + $0x528] ss:$16 sps:$4 sm:$0xff]   ;;  %v4798_v48 = vld [vmem:[#allocation5 + $0x544] ss:$16 sps:$4 sm:$0xff]  }
  0xc5   :  { %1393 = vmatprep.subr.bf16.mxu0 %v4706_v49  ;;  %1557 = vmatprep.subr.bf16.mxu1 %v4709_v50  ;;  %v4801_v49 = vld [vmem:[#allocation5 + $0x54c] ss:$16 sps:$4 sm:$0xff]   ;;  %v4796_v50 = vld [vmem:[#allocation5 + $0x540] ss:$16 sps:$4 sm:$0xff]  }
  0xc8   :  { %1394 = vmatpush1.bf16.msra.mxu0 %v4704_v51  ;;  %1558 = vmatpush1.bf16.msra.mxu1 %v4707_v52  ;;  %v4799_v51 = vld [vmem:[#allocation5 + $0x548] ss:$16 sps:$4 sm:$0xff]   ;;  %v4804_v52 = vld [vmem:[#allocation5 + $0x564] ss:$16 sps:$4 sm:$0xff]  }
  0xc9   :  { %1395 = vmatprep.subr.bf16.mxu0 %v4712_v53  ;;  %1559 = vmatprep.subr.bf16.mxu1 %v4715_v54  ;;  %v4807_v53 = vld [vmem:[#allocation5 + $0x56c] ss:$16 sps:$4 sm:$0xff]   ;;  %v4802_v54 = vld [vmem:[#allocation5 + $0x560] ss:$16 sps:$4 sm:$0xff]  }
  0xcc   :  { %1396 = vmatpush1.bf16.msra.mxu0 %v4710_v55  ;;  %1560 = vmatpush1.bf16.msra.mxu1 %v4713_v56  ;;  %v4805_v55 = vld [vmem:[#allocation5 + $0x568] ss:$16 sps:$4 sm:$0xff]   ;;  %v4810_v56 = vld [vmem:[#allocation5 + $0x584] ss:$16 sps:$4 sm:$0xff]  }
  0xcd   :  { %1397 = vmatprep.subr.bf16.mxu0 %v4718_v57  ;;  %1561 = vmatprep.subr.bf16.mxu1 %v4721_v58  ;;  %v4813_v57 = vld [vmem:[#allocation5 + $0x58c] ss:$16 sps:$4 sm:$0xff]   ;;  %v4808_v58 = vld [vmem:[#allocation5 + $0x580] ss:$16 sps:$4 sm:$0xff]  }
  0xd0   :  { %1398 = vmatpush1.bf16.msra.mxu0 %v4716_v59  ;;  %1562 = vmatpush1.bf16.msra.mxu1 %v4719_v60  ;;  %v4811_v59 = vld [vmem:[#allocation5 + $0x588] ss:$16 sps:$4 sm:$0xff]   ;;  %v4816_v60 = vld [vmem:[#allocation5 + $0x5a4] ss:$16 sps:$4 sm:$0xff]  }
  0xd1   :  { %1399 = vmatprep.subr.bf16.mxu0 %v4724_v61  ;;  %1563 = vmatprep.subr.bf16.mxu1 %v4727_v62  ;;  %v4819_v61 = vld [vmem:[#allocation5 + $0x5ac] ss:$16 sps:$4 sm:$0xff]   ;;  %v4814_v62 = vld [vmem:[#allocation5 + $0x5a0] ss:$16 sps:$4 sm:$0xff]  }
  0xd4   :  { %1400 = vmatpush1.bf16.msra.mxu0 %v4722_v63  ;;  %1564 = vmatpush1.bf16.msra.mxu1 %v4725_v0  ;;  %v4817_v63 = vld [vmem:[#allocation5 + $0x5a8] ss:$16 sps:$4 sm:$0xff]   ;;  %v4822_v0 = vld [vmem:[#allocation5 + $0x5c4] ss:$16 sps:$4 sm:$0xff]  }
  0xd5   :  { %1401 = vmatprep.subr.bf16.mxu0 %v4730_v1  ;;  %1565 = vmatprep.subr.bf16.mxu1 %v4733_v2  ;;  %v4825_v1 = vld [vmem:[#allocation5 + $0x5cc] ss:$16 sps:$4 sm:$0xff]   ;;  %v4820_v2 = vld [vmem:[#allocation5 + $0x5c0] ss:$16 sps:$4 sm:$0xff]  }
  0xd8   :  { %1402 = vmatpush1.bf16.msra.mxu0 %v4728_v3  ;;  %1566 = vmatpush1.bf16.msra.mxu1 %v4731_v4  ;;  %v4823_v3 = vld [vmem:[#allocation5 + $0x5c8] ss:$16 sps:$4 sm:$0xff]   ;;  %v4828_v4 = vld [vmem:[#allocation5 + $0x5e4] ss:$16 sps:$4 sm:$0xff]  }
  0xd9   :  { %1412 = vmatprep.subr.bf16.mxu0 %v4738_v5  ;;  %1576 = vmatprep.subr.bf16.mxu1 %v4741_v6  ;;  %v4831_v5 = vld [vmem:[#allocation5 + $0x5ec] ss:$16 sps:$4 sm:$0xff]   ;;  %v4826_v6 = vld [vmem:[#allocation5 + $0x5e0] ss:$16 sps:$4 sm:$0xff]  }
  0xdb   :  { %1404 = vmatmul.mubr.bf16.vlgmr.msra.gmra.mrb[0].mxu0 %v3941_v7  ;;  %1568 = vmatmul.mubr.bf16.vlgmr.msra.gmra.mrb[0].mxu1 %v3941_v7  ;;  %v4829_v7 = vld [vmem:[#allocation5 + $0x5e8] ss:$16 sps:$4 sm:$0xff]  }
  0xdc   :  { %1413 = vmatpush1.bf16.msra.mxu0 %v4736_v8  ;;  %1577 = vmatpush1.bf16.msra.mxu1 %v4739_v9  ;;  %v4836_v8 = vld [vmem:[#allocation5 + $0x604] ss:$16 sps:$4 sm:$0xff]   ;;  %v4839_v9 = vld [vmem:[#allocation5 + $0x60c] ss:$16 sps:$4 sm:$0xff]  }
  0xdd   :  { %1414 = vmatprep.subr.bf16.mxu0 %v4744_v10  ;;  %1578 = vmatprep.subr.bf16.mxu1 %v4747_v12  ;;  %v4834_v10 = vld [vmem:[#allocation5 + $0x600] ss:$16 sps:$4 sm:$0xff]   ;;  %v4837_v12 = vld [vmem:[#allocation5 + $0x608] ss:$16 sps:$4 sm:$0xff]  }
  0xde   :  { %1444 = vmatprep.mubr.bf16.mxu0 %v3944_v13  ;;  %1608 = vmatprep.mubr.bf16.mxu1 %v3944_v13  ;;  %v3943_v13 = vcombine.low %v5533_v11, %v5533_v11  ;;  %v4852_v11 = vld [vmem:[#allocation7 + $0x2c] ss:$16 sps:$4 sm:$0xff]  }
  0xe0   :  { %1415 = vmatpush1.bf16.msra.mxu0 %v4742_v14  ;;  %1579 = vmatpush1.bf16.msra.mxu1 %v4745_v15  ;;  %v4843_v14 = vld [vmem:[#allocation7 + $0x4] ss:$16 sps:$4 sm:$0xff]   ;;  %v4846_v15 = vld [vmem:[#allocation7 + $0xc] ss:$16 sps:$4 sm:$0xff]  }
  0xe1   :  { %1416 = vmatprep.subr.bf16.mxu0 %v4750_v16  ;;  %1580 = vmatprep.subr.bf16.mxu1 %v4753_v17  ;;  %v5406_v16 = vmov 0   ;;  %v4840_v17 = vld [vmem:[#allocation2 + $0x18] ss:$0 sps:$4 sm:$0xff]  }
  0xe4   :  { %1417 = vmatpush1.bf16.msra.mxu0 %v4748_v18  ;;  %1581 = vmatpush1.bf16.msra.mxu1 %v4751_v19  ;;  %v4841_v18 = vld [vmem:[#allocation7] ss:$16 sps:$4 sm:$0xff]   ;;  %v4844_v19 = vld [vmem:[#allocation7 + $0x8] ss:$16 sps:$4 sm:$0xff]  }
  0xe5   :  { %1418 = vmatprep.subr.bf16.mxu0 %v4756_v20  ;;  %1582 = vmatprep.subr.bf16.mxu1 %v4759_v21  ;;  %v4849_v20 = vld [vmem:[#allocation7 + $0x24] ss:$16 sps:$4 sm:$0xff]   ;;  %v4847_v21 = vld [vmem:[#allocation7 + $0x20] ss:$16 sps:$4 sm:$0xff]  }
  0xe8   :  { %1419 = vmatpush1.bf16.msra.mxu0 %v4754_v22  ;;  %1583 = vmatpush1.bf16.msra.mxu1 %v4757_v23  ;;  %v4850_v22 = vld [vmem:[#allocation7 + $0x28] ss:$16 sps:$4 sm:$0xff]   ;;  %v4855_v23 = vld [vmem:[#allocation7 + $0x44] ss:$16 sps:$4 sm:$0xff]  }
  0xe9   :  { %1420 = vmatprep.subr.bf16.mxu0 %v4762_v24  ;;  %1584 = vmatprep.subr.bf16.mxu1 %v4765_v25  ;;  %v4858_v24 = vld [vmem:[#allocation7 + $0x4c] ss:$16 sps:$4 sm:$0xff]   ;;  %v4853_v25 = vld [vmem:[#allocation7 + $0x40] ss:$16 sps:$4 sm:$0xff]  }
  0xec   :  { %1421 = vmatpush1.bf16.msra.mxu0 %v4760_v26  ;;  %1585 = vmatpush1.bf16.msra.mxu1 %v4763_v27  ;;  %v4856_v26 = vld [vmem:[#allocation7 + $0x48] ss:$16 sps:$4 sm:$0xff]   ;;  %v4861_v27 = vld [vmem:[#allocation7 + $0x64] ss:$16 sps:$4 sm:$0xff]  }
  0xed   :  { %1422 = vmatprep.subr.bf16.mxu0 %v4768_v28  ;;  %1586 = vmatprep.subr.bf16.mxu1 %v4771_v29  ;;  %v4864_v28 = vld [vmem:[#allocation7 + $0x6c] ss:$16 sps:$4 sm:$0xff]   ;;  %v4859_v29 = vld [vmem:[#allocation7 + $0x60] ss:$16 sps:$4 sm:$0xff]  }
  0xf0   :  { %1423 = vmatpush1.bf16.msra.mxu0 %v4766_v30  ;;  %1587 = vmatpush1.bf16.msra.mxu1 %v4769_v31  ;;  %v4862_v30 = vld [vmem:[#allocation7 + $0x68] ss:$16 sps:$4 sm:$0xff]   ;;  %v4867_v31 = vld [vmem:[#allocation7 + $0x84] ss:$16 sps:$4 sm:$0xff]  }
  0xf1   :  { %1424 = vmatprep.subr.bf16.mxu0 %v4774_v32  ;;  %1588 = vmatprep.subr.bf16.mxu1 %v4777_v33  ;;  %v4870_v32 = vld [vmem:[#allocation7 + $0x8c] ss:$16 sps:$4 sm:$0xff]   ;;  %v4865_v33 = vld [vmem:[#allocation7 + $0x80] ss:$16 sps:$4 sm:$0xff]  }
  0xf4   :  { %1425 = vmatpush1.bf16.msra.mxu0 %v4772_v34  ;;  %1589 = vmatpush1.bf16.msra.mxu1 %v4775_v35  ;;  %v4868_v34 = vld [vmem:[#allocation7 + $0x88] ss:$16 sps:$4 sm:$0xff]   ;;  %v4873_v35 = vld [vmem:[#allocation7 + $0xa4] ss:$16 sps:$4 sm:$0xff]  }
  0xf5   :  { %1426 = vmatprep.subr.bf16.mxu0 %v4780_v36  ;;  %1590 = vmatprep.subr.bf16.mxu1 %v4783_v37  ;;  %v4876_v36 = vld [vmem:[#allocation7 + $0xac] ss:$16 sps:$4 sm:$0xff]   ;;  %v4871_v37 = vld [vmem:[#allocation7 + $0xa0] ss:$16 sps:$4 sm:$0xff]  }
  0xf8   :  { %1427 = vmatpush1.bf16.msra.mxu0 %v4778_v38  ;;  %1591 = vmatpush1.bf16.msra.mxu1 %v4781_v39  ;;  %v4874_v38 = vld [vmem:[#allocation7 + $0xa8] ss:$16 sps:$4 sm:$0xff]   ;;  %v4879_v39 = vld [vmem:[#allocation7 + $0xc4] ss:$16 sps:$4 sm:$0xff]  }
  0xf9   :  { %1428 = vmatprep.subr.bf16.mxu0 %v4786_v40  ;;  %1592 = vmatprep.subr.bf16.mxu1 %v4789_v41  ;;  %v4882_v40 = vld [vmem:[#allocation7 + $0xcc] ss:$16 sps:$4 sm:$0xff]   ;;  %v4877_v41 = vld [vmem:[#allocation7 + $0xc0] ss:$16 sps:$4 sm:$0xff]  }
  0xfc   :  { %1429 = vmatpush1.bf16.msra.mxu0 %v4784_v42  ;;  %1593 = vmatpush1.bf16.msra.mxu1 %v4787_v43  ;;  %v4880_v42 = vld [vmem:[#allocation7 + $0xc8] ss:$16 sps:$4 sm:$0xff]   ;;  %v4885_v43 = vld [vmem:[#allocation7 + $0xe4] ss:$16 sps:$4 sm:$0xff]  }
  0xfd   :  { %1430 = vmatprep.subr.bf16.mxu0 %v4792_v44  ;;  %1594 = vmatprep.subr.bf16.mxu1 %v4795_v45  ;;  %v4888_v44 = vld [vmem:[#allocation7 + $0xec] ss:$16 sps:$4 sm:$0xff]   ;;  %v4883_v45 = vld [vmem:[#allocation7 + $0xe0] ss:$16 sps:$4 sm:$0xff]  }
 0x100   :  { %1431 = vmatpush1.bf16.msra.mxu0 %v4790_v46  ;;  %1595 = vmatpush1.bf16.msra.mxu1 %v4793_v47  ;;  %v4886_v46 = vld [vmem:[#allocation7 + $0xe8] ss:$16 sps:$4 sm:$0xff]   ;;  %v4891_v47 = vld [vmem:[#allocation7 + $0x104] ss:$16 sps:$4 sm:$0xff]  }
 0x101   :  { %1432 = vmatprep.subr.bf16.mxu0 %v4798_v48  ;;  %1596 = vmatprep.subr.bf16.mxu1 %v4801_v49  ;;  %v4894_v48 = vld [vmem:[#allocation7 + $0x10c] ss:$16 sps:$4 sm:$0xff]   ;;  %v4889_v49 = vld [vmem:[#allocation7 + $0x100] ss:$16 sps:$4 sm:$0xff]  }
 0x104   :  { %1433 = vmatpush1.bf16.msra.mxu0 %v4796_v50  ;;  %1597 = vmatpush1.bf16.msra.mxu1 %v4799_v51  ;;  %v4892_v50 = vld [vmem:[#allocation7 + $0x108] ss:$16 sps:$4 sm:$0xff]   ;;  %v4897_v51 = vld [vmem:[#allocation7 + $0x124] ss:$16 sps:$4 sm:$0xff]  }
 0x105   :  { %1434 = vmatprep.subr.bf16.mxu0 %v4804_v52  ;;  %1598 = vmatprep.subr.bf16.mxu1 %v4807_v53  ;;  %v4900_v52 = vld [vmem:[#allocation7 + $0x12c] ss:$16 sps:$4 sm:$0xff]   ;;  %v4895_v53 = vld [vmem:[#allocation7 + $0x120] ss:$16 sps:$4 sm:$0xff]  }
 0x108   :  { %1435 = vmatpush1.bf16.msra.mxu0 %v4802_v54  ;;  %1599 = vmatpush1.bf16.msra.mxu1 %v4805_v55  ;;  %v4898_v54 = vld [vmem:[#allocation7 + $0x128] ss:$16 sps:$4 sm:$0xff]   ;;  %v4903_v55 = vld [vmem:[#allocation7 + $0x144] ss:$16 sps:$4 sm:$0xff]  }
 0x109   :  { %1436 = vmatprep.subr.bf16.mxu0 %v4810_v56  ;;  %1600 = vmatprep.subr.bf16.mxu1 %v4813_v57  ;;  %v4906_v56 = vld [vmem:[#allocation7 + $0x14c] ss:$16 sps:$4 sm:$0xff]   ;;  %v4901_v57 = vld [vmem:[#allocation7 + $0x140] ss:$16 sps:$4 sm:$0xff]  }
 0x10c   :  { %1437 = vmatpush1.bf16.msra.mxu0 %v4808_v58  ;;  %1601 = vmatpush1.bf16.msra.mxu1 %v4811_v59  ;;  %v4904_v58 = vld [vmem:[#allocation7 + $0x148] ss:$16 sps:$4 sm:$0xff]   ;;  %v4909_v59 = vld [vmem:[#allocation7 + $0x164] ss:$16 sps:$4 sm:$0xff]  }
 0x10d   :  { %1438 = vmatprep.subr.bf16.mxu0 %v4816_v60  ;;  %1602 = vmatprep.subr.bf16.mxu1 %v4819_v61  ;;  %v4912_v60 = vld [vmem:[#allocation7 + $0x16c] ss:$16 sps:$4 sm:$0xff]   ;;  %v4907_v61 = vld [vmem:[#allocation7 + $0x160] ss:$16 sps:$4 sm:$0xff]  }
 0x110   :  { %1439 = vmatpush1.bf16.msra.mxu0 %v4814_v62  ;;  %1603 = vmatpush1.bf16.msra.mxu1 %v4817_v63  ;;  %v4910_v62 = vld [vmem:[#allocation7 + $0x168] ss:$16 sps:$4 sm:$0xff]   ;;  %v4915_v63 = vld [vmem:[#allocation7 + $0x184] ss:$16 sps:$4 sm:$0xff]  }
 0x111   :  { %1440 = vmatprep.subr.bf16.mxu0 %v4822_v0  ;;  %1604 = vmatprep.subr.bf16.mxu1 %v4825_v1  ;;  %v4918_v0 = vld [vmem:[#allocation7 + $0x18c] ss:$16 sps:$4 sm:$0xff]   ;;  %v4913_v1 = vld [vmem:[#allocation7 + $0x180] ss:$16 sps:$4 sm:$0xff]  }
 0x114   :  { %1441 = vmatpush1.bf16.msra.mxu0 %v4820_v2  ;;  %1605 = vmatpush1.bf16.msra.mxu1 %v4823_v3  ;;  %v4916_v2 = vld [vmem:[#allocation7 + $0x188] ss:$16 sps:$4 sm:$0xff]   ;;  %v4921_v3 = vld [vmem:[#allocation7 + $0x1a4] ss:$16 sps:$4 sm:$0xff]  }
 0x115   :  { %1442 = vmatprep.subr.bf16.mxu0 %v4828_v4  ;;  %1606 = vmatprep.subr.bf16.mxu1 %v4831_v5  ;;  %v4924_v4 = vld [vmem:[#allocation7 + $0x1ac] ss:$16 sps:$4 sm:$0xff]   ;;  %v4919_v5 = vld [vmem:[#allocation7 + $0x1a0] ss:$16 sps:$4 sm:$0xff]  }
 0x118   :  { %1443 = vmatpush1.bf16.msra.mxu0 %v4826_v6  ;;  %1607 = vmatpush1.bf16.msra.mxu1 %v4829_v7  ;;  %v4922_v6 = vld [vmem:[#allocation7 + $0x1a8] ss:$16 sps:$4 sm:$0xff]   ;;  %v4927_v7 = vld [vmem:[#allocation7 + $0x1c4] ss:$16 sps:$4 sm:$0xff]  }
 0x119   :  { %1453 = vmatprep.subr.bf16.mxu0 %v4836_v8  ;;  %1617 = vmatprep.subr.bf16.mxu1 %v4839_v9  ;;  %v4930_v8 = vld [vmem:[#allocation7 + $0x1cc] ss:$16 sps:$4 sm:$0xff]   ;;  %v4925_v9 = vld [vmem:[#allocation7 + $0x1c0] ss:$16 sps:$4 sm:$0xff]  }
 0x11b   :  { %1445 = vmatmul.mubr.bf16.vlgmr.msra.gmra.mrb[0].mxu0 %v3943_v13  ;;  %1609 = vmatmul.mubr.bf16.vlgmr.msra.gmra.mrb[0].mxu1 %v3943_v13  ;;  %v4936_v13 = vld [vmem:[#allocation7 + $0x1ec] ss:$16 sps:$4 sm:$0xff]  }
 0x11c   :  { %1454 = vmatpush1.bf16.msra.mxu0 %v4834_v10  ;;  %1618 = vmatpush1.bf16.msra.mxu1 %v4837_v12  ;;  %v4928_v10 = vld [vmem:[#allocation7 + $0x1c8] ss:$16 sps:$4 sm:$0xff]   ;;  %v4933_v12 = vld [vmem:[#allocation7 + $0x1e4] ss:$16 sps:$4 sm:$0xff]  }
 0x11d   :  { %1485 = vmatprep.mubr.bf16.mxu0 %v5406_v16  ;;  %1649 = vmatprep.mubr.bf16.mxu1 %v5406_v16  ;;  %v4939_v16 = vld [vmem:[#allocation7 + $0x204] ss:$16 sps:$4 sm:$0xff]  }
 0x11e   :  { %2452 = vmatprep.subr.bf16.mxu0 %v4843_v14  ;;  %2534 = vmatprep.subr.bf16.mxu1 %v4846_v15  ;;  %v4931_v14 = vld [vmem:[#allocation7 + $0x1e0] ss:$16 sps:$4 sm:$0xff]   ;;  %v4934_v15 = vld [vmem:[#allocation7 + $0x1e8] ss:$16 sps:$4 sm:$0xff]  }
 0x127   :  { %4142 = vmatmul.mubr.msk.bf16.vlgmr.msra.gmra.mrb[0].mxu0 %vm1326_vm0, %v4840_v17  ;;  %4143 = vmatmul.mubr.msk.bf16.vlgmr.msra.gmra.mrb[0].mxu1 %vm1326_vm0, %v4840_v17  ;;  %v4942_v17 = vld [vmem:[#allocation7 + $0x20c] ss:$16 sps:$4 sm:$0xff]  }
 0x128   :  { %2453 = vmatpush1.bf16.msra.mxu0 %v4841_v18  ;;  %2535 = vmatpush1.bf16.msra.mxu1 %v4844_v19  ;;  %v302_v18 = vlaneseq }
 0x129   :  { %2454 = vmatprep.subr.bf16.mxu0 %v4849_v20  ;;  %2536 = vmatprep.subr.bf16.mxu1 %v4852_v11  ;;  %v5547_v11 = vld [vmem:[%s5609_s2] sm:$0xf] }
 0x12a   :  { %v5539_v19 = vshrl.u32 %v302_v18, 7  ;;  %v5000_v18 = vld [vmem:[#allocation7 + $0x348] ss:$16 sps:$4 sm:$0xff]  }
 0x12c   :  { %2455 = vmatpush1.bf16.msra.mxu0 %v4847_v21  ;;  %2537 = vmatpush1.bf16.msra.mxu1 %v4850_v22  ;;  %v5542_v20 = vsub.s32 0, %v5539_v19  ;;  %v5550_v21 = vsub.s32 1, %v5539_v19  ;;  %v5553_v22 = vsub.s32 3, %v5539_v19 }
 0x12d   :  { %2456 = vmatprep.subr.bf16.mxu0 %v4855_v23  ;;  %2538 = vmatprep.subr.bf16.mxu1 %v4858_v24 }
 0x12e   :  { %v305_v23 = vrot.slane %v5547_v11, %v5542_v20  ;;  %v309_v24 = vrot.slane %v5547_v11, %v5550_v21 }
 0x130   :  { %2457 = vmatpush1.bf16.msra.mxu0 %v4853_v25  ;;  %2539 = vmatpush1.bf16.msra.mxu1 %v4856_v26  ;;  %v317_v25 = vrot.slane %v5547_v11, %v5553_v22 }
 0x131   :  { %2458 = vmatprep.subr.bf16.mxu0 %v4861_v27  ;;  %2540 = vmatprep.subr.bf16.mxu1 %v4864_v28 }
 0x134   :  { %2459 = vmatpush1.bf16.msra.mxu0 %v4859_v29  ;;  %2541 = vmatpush1.bf16.msra.mxu1 %v4862_v30 }
 0x135   :  { %2460 = vmatprep.subr.bf16.mxu0 %v4867_v31  ;;  %2542 = vmatprep.subr.bf16.mxu1 %v4870_v32 }
 0x138   :  { %2461 = vmatpush1.bf16.msra.mxu0 %v4865_v33  ;;  %2543 = vmatpush1.bf16.msra.mxu1 %v4868_v34 }
 0x139   :  { %2462 = vmatprep.subr.bf16.mxu0 %v4873_v35  ;;  %2544 = vmatprep.subr.bf16.mxu1 %v4876_v36 }
 0x13c   :  { %2463 = vmatpush1.bf16.msra.mxu0 %v4871_v37  ;;  %2545 = vmatpush1.bf16.msra.mxu1 %v4874_v38  ;;  %v4937_v38 = vld [vmem:[#allocation7 + $0x200] ss:$16 sps:$4 sm:$0xff]  }
 0x13d   :  { %2464 = vmatprep.subr.bf16.mxu0 %v4879_v39  ;;  %2546 = vmatprep.subr.bf16.mxu1 %v4882_v40  ;;  %v4940_v39 = vld [vmem:[#allocation7 + $0x208] ss:$16 sps:$4 sm:$0xff]  }
 0x140   :  { %2465 = vmatpush1.bf16.msra.mxu0 %v4877_v41  ;;  %2547 = vmatpush1.bf16.msra.mxu1 %v4880_v42  ;;  %v4945_v41 = vld [vmem:[#allocation7 + $0x224] ss:$16 sps:$4 sm:$0xff]   ;;  %v4948_v42 = vld [vmem:[#allocation7 + $0x22c] ss:$16 sps:$4 sm:$0xff]  }
 0x141   :  { %2466 = vmatprep.subr.bf16.mxu0 %v4885_v43  ;;  %2548 = vmatprep.subr.bf16.mxu1 %v4888_v44  ;;  %v4943_v44 = vld [vmem:[#allocation7 + $0x220] ss:$16 sps:$4 sm:$0xff]  }
 0x144   :  { %2467 = vmatpush1.bf16.msra.mxu0 %v4883_v45  ;;  %2549 = vmatpush1.bf16.msra.mxu1 %v4886_v46  ;;  %v4946_v45 = vld [vmem:[#allocation7 + $0x228] ss:$16 sps:$4 sm:$0xff]   ;;  %v4951_v46 = vld [vmem:[#allocation7 + $0x244] ss:$16 sps:$4 sm:$0xff]  }
 0x145   :  { %2468 = vmatprep.subr.bf16.mxu0 %v4891_v47  ;;  %2550 = vmatprep.subr.bf16.mxu1 %v4894_v48  ;;  %v4954_v47 = vld [vmem:[#allocation7 + $0x24c] ss:$16 sps:$4 sm:$0xff]   ;;  %v4949_v48 = vld [vmem:[#allocation7 + $0x240] ss:$16 sps:$4 sm:$0xff]  }
 0x148   :  { %2469 = vmatpush1.bf16.msra.mxu0 %v4889_v49  ;;  %2551 = vmatpush1.bf16.msra.mxu1 %v4892_v50  ;;  %v4952_v49 = vld [vmem:[#allocation7 + $0x248] ss:$16 sps:$4 sm:$0xff]   ;;  %v4957_v50 = vld [vmem:[#allocation7 + $0x264] ss:$16 sps:$4 sm:$0xff]  }
 0x149   :  { %2470 = vmatprep.subr.bf16.mxu0 %v4897_v51  ;;  %2552 = vmatprep.subr.bf16.mxu1 %v4900_v52  ;;  %v4960_v51 = vld [vmem:[#allocation7 + $0x26c] ss:$16 sps:$4 sm:$0xff]   ;;  %v4955_v52 = vld [vmem:[#allocation7 + $0x260] ss:$16 sps:$4 sm:$0xff]  }
 0x14c   :  { %2471 = vmatpush1.bf16.msra.mxu0 %v4895_v53  ;;  %2553 = vmatpush1.bf16.msra.mxu1 %v4898_v54  ;;  %v4958_v53 = vld [vmem:[#allocation7 + $0x268] ss:$16 sps:$4 sm:$0xff]   ;;  %v4963_v54 = vld [vmem:[#allocation7 + $0x284] ss:$16 sps:$4 sm:$0xff]  }
 0x14d   :  { %2472 = vmatprep.subr.bf16.mxu0 %v4903_v55  ;;  %2554 = vmatprep.subr.bf16.mxu1 %v4906_v56  ;;  %v4966_v55 = vld [vmem:[#allocation7 + $0x28c] ss:$16 sps:$4 sm:$0xff]   ;;  %v4961_v56 = vld [vmem:[#allocation7 + $0x280] ss:$16 sps:$4 sm:$0xff]  }
 0x150   :  { %2473 = vmatpush1.bf16.msra.mxu0 %v4901_v57  ;;  %2555 = vmatpush1.bf16.msra.mxu1 %v4904_v58  ;;  %v4964_v57 = vld [vmem:[#allocation7 + $0x288] ss:$16 sps:$4 sm:$0xff]   ;;  %v4969_v58 = vld [vmem:[#allocation7 + $0x2a4] ss:$16 sps:$4 sm:$0xff]  }
 0x151   :  { %2474 = vmatprep.subr.bf16.mxu0 %v4909_v59  ;;  %2556 = vmatprep.subr.bf16.mxu1 %v4912_v60  ;;  %v4972_v59 = vld [vmem:[#allocation7 + $0x2ac] ss:$16 sps:$4 sm:$0xff]   ;;  %v4967_v60 = vld [vmem:[#allocation7 + $0x2a0] ss:$16 sps:$4 sm:$0xff]  }
 0x154   :  { %2475 = vmatpush1.bf16.msra.mxu0 %v4907_v61  ;;  %2557 = vmatpush1.bf16.msra.mxu1 %v4910_v62  ;;  %v4970_v61 = vld [vmem:[#allocation7 + $0x2a8] ss:$16 sps:$4 sm:$0xff]   ;;  %v4975_v62 = vld [vmem:[#allocation7 + $0x2c4] ss:$16 sps:$4 sm:$0xff]  }
 0x155   :  { %2476 = vmatprep.subr.bf16.mxu0 %v4915_v63  ;;  %2558 = vmatprep.subr.bf16.mxu1 %v4918_v0  ;;  %v4978_v63 = vld [vmem:[#allocation7 + $0x2cc] ss:$16 sps:$4 sm:$0xff]   ;;  %v4973_v0 = vld [vmem:[#allocation7 + $0x2c0] ss:$16 sps:$4 sm:$0xff]  }
 0x158   :  { %2477 = vmatpush1.bf16.msra.mxu0 %v4913_v1  ;;  %2559 = vmatpush1.bf16.msra.mxu1 %v4916_v2  ;;  %v4976_v1 = vld [vmem:[#allocation7 + $0x2c8] ss:$16 sps:$4 sm:$0xff]   ;;  %v4981_v2 = vld [vmem:[#allocation7 + $0x2e4] ss:$16 sps:$4 sm:$0xff]  }
 0x159   :  { %2478 = vmatprep.subr.bf16.mxu0 %v4921_v3  ;;  %2560 = vmatprep.subr.bf16.mxu1 %v4924_v4  ;;  %v4984_v3 = vld [vmem:[#allocation7 + $0x2ec] ss:$16 sps:$4 sm:$0xff]   ;;  %v4979_v4 = vld [vmem:[#allocation7 + $0x2e0] ss:$16 sps:$4 sm:$0xff]  }
 0x15c   :  { %2479 = vmatpush1.bf16.msra.mxu0 %v4919_v5  ;;  %2561 = vmatpush1.bf16.msra.mxu1 %v4922_v6  ;;  %v4982_v5 = vld [vmem:[#allocation7 + $0x2e8] ss:$16 sps:$4 sm:$0xff]   ;;  %v4987_v6 = vld [vmem:[#allocation7 + $0x304] ss:$16 sps:$4 sm:$0xff]  }
 0x15d   :  { %2480 = vmatprep.subr.bf16.mxu0 %v4927_v7  ;;  %2562 = vmatprep.subr.bf16.mxu1 %v4930_v8  ;;  %v4990_v7 = vld [vmem:[#allocation7 + $0x30c] ss:$16 sps:$4 sm:$0xff]   ;;  %v4985_v8 = vld [vmem:[#allocation7 + $0x300] ss:$16 sps:$4 sm:$0xff]  }
 0x160   :  { %2481 = vmatpush1.bf16.msra.mxu0 %v4925_v9  ;;  %2563 = vmatpush1.bf16.msra.mxu1 %v4928_v10  ;;  %v4988_v9 = vld [vmem:[#allocation7 + $0x308] ss:$16 sps:$4 sm:$0xff]   ;;  %v4993_v10 = vld [vmem:[#allocation7 + $0x324] ss:$16 sps:$4 sm:$0xff]  }
 0x161   :  { %2482 = vmatprep.subr.bf16.mxu0 %v4933_v12  ;;  %2564 = vmatprep.subr.bf16.mxu1 %v4936_v13  ;;  %v4996_v12 = vld [vmem:[#allocation7 + $0x32c] ss:$16 sps:$4 sm:$0xff]   ;;  %v4991_v13 = vld [vmem:[#allocation7 + $0x320] ss:$16 sps:$4 sm:$0xff]  }
 0x164   :  { %2483 = vmatpush1.bf16.msra.mxu0 %v4931_v14  ;;  %2565 = vmatpush1.bf16.msra.mxu1 %v4934_v15  ;;  %v4994_v14 = vld [vmem:[#allocation7 + $0x328] ss:$16 sps:$4 sm:$0xff]   ;;  %v4999_v15 = vld [vmem:[#allocation7 + $0x344] ss:$16 sps:$4 sm:$0xff]  }
 0x165   :  { %2493 = vmatprep.subr.bf16.mxu0 %v4939_v16  ;;  %2575 = vmatprep.subr.bf16.mxu1 %v4942_v17  ;;  %v5002_v16 = vld [vmem:[#allocation7 + $0x34c] ss:$16 sps:$4 sm:$0xff]   ;;  %v4997_v17 = vld [vmem:[#allocation7 + $0x340] ss:$16 sps:$4 sm:$0xff]  }
 0x1fa   :  { %v1487_v26 = vpop.f32.mrb[0].mxu0  ;;  %v5561_v27 = vpop.f32.mrb[0].mxu1 }
 0x1fb   :  { %v4477_v28 = vadd.f32 %v1487_v26, %v305_v23  ;;  %v1489_v29 = vpop.f32.mrb[1].mxu0  ;;  %v1653_v30 = vpop.f32.mrb[1].mxu1  ;;  %v5005_v23 = vld [vmem:[#allocation7 + $0x364] ss:$16 sps:$4 sm:$0xff]   ;;  %v5006_v26 = vld [vmem:[#allocation7 + $0x368] ss:$16 sps:$4 sm:$0xff]  }
 0x1fc   :  { %v4478_v31 = vadd.f32 %v1489_v29, %v309_v24  ;;  %v1491_v32 = vpop.f32.mrb[2].mxu0  ;;  %v1655_v33 = vpop.f32.mrb[2].mxu1  ;;  %v4480_v34 = vadd.f32 %v1653_v30, %v317_v25  ;;  %v5008_v24 = vld [vmem:[#allocation7 + $0x36c] ss:$16 sps:$4 sm:$0xff]   ;;  %v5003_v25 = vld [vmem:[#allocation7 + $0x360] ss:$16 sps:$4 sm:$0xff]  }
 0x1fd   :  { %v1492_v35 = vpop.f32.mrb[3].mxu0  ;;  %v1656_v36 = vpop.f32.mrb[3].mxu1  ;;  %v1658_v40 = vpack.c.bf16 %v4477_v28, %v4477_v28  ;;  %v5011_v28 = vld [vmem:[#allocation7 + $0x384] ss:$16 sps:$4 sm:$0xff]   ;;  %v5014_v29 = vld [vmem:[#allocation7 + $0x38c] ss:$16 sps:$4 sm:$0xff]  }
 0x1fe   :  { %v1659_v37 = vpack.c.bf16 %v4478_v31, %v4478_v31  ;;  %v1661_v43 = vpack.c.bf16 %v4480_v34, %v4480_v34  ;;  %v5009_v30 = vld [vmem:[#allocation7 + $0x380] ss:$16 sps:$4 sm:$0xff]   ;;  %v5012_v31 = vld [vmem:[#allocation7 + $0x388] ss:$16 sps:$4 sm:$0xff]   ;;  %v5017_v32 = vld [vmem:[#allocation7 + $0x3a4] ss:$16 sps:$4 sm:$0xff]  }
 0x1ff   :  { %v5020_v33 = vld [vmem:[#allocation7 + $0x3ac] ss:$16 sps:$4 sm:$0xff]   ;;  %v5015_v34 = vld [vmem:[#allocation7 + $0x3a0] ss:$16 sps:$4 sm:$0xff]   ;;  %v5018_v35 = vld [vmem:[#allocation7 + $0x3a8] ss:$16 sps:$4 sm:$0xff]  }
 0x200   :  { %2484 = vmatprep.mubr.bf16.mxu0 %v1659_v37  ;;  %2566 = vmatprep.mubr.bf16.mxu1 %v1659_v37  ;;  %v5564_v36 = vsub.s32 2, %v5539_v19  ;;  %v5023_v37 = vld [vmem:[#allocation7 + $0x3c4] ss:$16 sps:$4 sm:$0xff]   ;;  %v5030_v19 = vld [vmem:[#allocation7 + $0x3e8] ss:$16 sps:$4 sm:$0xff]  }
 0x201   :  { %2485 = vmatmul.mubr.bf16.vlgmr.msra.gmra.mrb[4].mxu0 %v1658_v40  ;;  %2567 = vmatmul.mubr.bf16.vlgmr.msra.gmra.mrb[4].mxu1 %v1658_v40  ;;  %v5024_v40 = vld [vmem:[#allocation7 + $0x3c8] ss:$16 sps:$4 sm:$0xff]  }
 0x202   :  { %2494 = vmatpush1.bf16.msra.mxu0 %v4937_v38  ;;  %2576 = vmatpush1.bf16.msra.mxu1 %v4940_v39  ;;  %v5026_v38 = vld [vmem:[#allocation7 + $0x3cc] ss:$16 sps:$4 sm:$0xff]   ;;  %v5021_v39 = vld [vmem:[#allocation7 + $0x3c0] ss:$16 sps:$4 sm:$0xff]  }
 0x203   :  { %2525 = vmatprep.mubr.bf16.mxu0 %v1661_v43  ;;  %2607 = vmatprep.mubr.bf16.mxu1 %v1661_v43  ;;  %v5032_v43 = vld [vmem:[#allocation7 + $0x3ec] ss:$16 sps:$4 sm:$0xff]  }
 0x204   :  { %2495 = vmatprep.subr.bf16.mxu0 %v4945_v41  ;;  %2577 = vmatprep.subr.bf16.mxu1 %v4948_v42  ;;  %v313_v41 = vrot.slane %v5547_v11, %v5564_v36  ;;  %v5029_v42 = vld [vmem:[#allocation7 + $0x3e4] ss:$16 sps:$4 sm:$0xff]  }
 0x205   :  { %v5041_v11 = vld [vmem:[#allocation8 + $0x24] ss:$16 sps:$4 sm:$0xff]  }
 0x206   :  { %2496 = vmatpush1.bf16.msra.mxu0 %v4943_v44  ;;  %2578 = vmatpush1.bf16.msra.mxu1 %v4946_v45  ;;  %v5027_v44 = vld [vmem:[#allocation7 + $0x3e0] ss:$16 sps:$4 sm:$0xff]   ;;  %v4479_v45 = vadd.f32 %v5561_v27, %v313_v41  ;;  %v5047_v27 = vld [vmem:[#allocation8 + $0x44] ss:$16 sps:$4 sm:$0xff]   ;;  %v5116_v41 = vld [vmem:[#allocation8 + $0x1ac] ss:$16 sps:$4 sm:$0xff]  }
 0x207   :  { %2497 = vmatprep.subr.bf16.mxu0 %v4951_v46  ;;  %2579 = vmatprep.subr.bf16.mxu1 %v4954_v47  ;;  %v5035_v46 = vld [vmem:[#allocation8 + $0x4] ss:$16 sps:$4 sm:$0xff]   ;;  %v5038_v47 = vld [vmem:[#allocation8 + $0xc] ss:$16 sps:$4 sm:$0xff]  }
 0x20a   :  { %2498 = vmatpush1.bf16.msra.mxu0 %v4949_v48  ;;  %2580 = vmatpush1.bf16.msra.mxu1 %v4952_v49  ;;  %v5033_v48 = vld [vmem:[#allocation8] ss:$16 sps:$4 sm:$0xff]   ;;  %v5036_v49 = vld [vmem:[#allocation8 + $0x8] ss:$16 sps:$4 sm:$0xff]  }
 0x20b   :  { %2499 = vmatprep.subr.bf16.mxu0 %v4957_v50  ;;  %2581 = vmatprep.subr.bf16.mxu1 %v4960_v51  ;;  %v1660_v50 = vpack.c.bf16 %v4479_v45, %v4479_v45  ;;  %v5044_v51 = vld [vmem:[#allocation8 + $0x2c] ss:$16 sps:$4 sm:$0xff]   ;;  %v5117_v45 = vld [vmem:[#allocation8 + $0x1c0] ss:$16 sps:$4 sm:$0xff]  }
 0x20e   :  { %2500 = vmatpush1.bf16.msra.mxu0 %v4955_v52  ;;  %2582 = vmatpush1.bf16.msra.mxu1 %v4958_v53  ;;  %v5039_v52 = vld [vmem:[#allocation8 + $0x20] ss:$16 sps:$4 sm:$0xff]   ;;  %v5042_v53 = vld [vmem:[#allocation8 + $0x28] ss:$16 sps:$4 sm:$0xff]  }
 0x20f   :  { %2501 = vmatprep.subr.bf16.mxu0 %v4963_v54  ;;  %2583 = vmatprep.subr.bf16.mxu1 %v4966_v55  ;;  %v5050_v54 = vld [vmem:[#allocation8 + $0x4c] ss:$16 sps:$4 sm:$0xff]   ;;  %v5045_v55 = vld [vmem:[#allocation8 + $0x40] ss:$16 sps:$4 sm:$0xff]  }
 0x212   :  { %2502 = vmatpush1.bf16.msra.mxu0 %v4961_v56  ;;  %2584 = vmatpush1.bf16.msra.mxu1 %v4964_v57  ;;  %v5048_v56 = vld [vmem:[#allocation8 + $0x48] ss:$16 sps:$4 sm:$0xff]   ;;  %v5053_v57 = vld [vmem:[#allocation8 + $0x64] ss:$16 sps:$4 sm:$0xff]  }
 0x213   :  { %2503 = vmatprep.subr.bf16.mxu0 %v4969_v58  ;;  %2585 = vmatprep.subr.bf16.mxu1 %v4972_v59  ;;  %v5056_v58 = vld [vmem:[#allocation8 + $0x6c] ss:$16 sps:$4 sm:$0xff]   ;;  %v5051_v59 = vld [vmem:[#allocation8 + $0x60] ss:$16 sps:$4 sm:$0xff]  }
 0x216   :  { %2504 = vmatpush1.bf16.msra.mxu0 %v4967_v60  ;;  %2586 = vmatpush1.bf16.msra.mxu1 %v4970_v61  ;;  %v5054_v60 = vld [vmem:[#allocation8 + $0x68] ss:$16 sps:$4 sm:$0xff]   ;;  %v5059_v61 = vld [vmem:[#allocation8 + $0x84] ss:$16 sps:$4 sm:$0xff]  }
 0x217   :  { %2505 = vmatprep.subr.bf16.mxu0 %v4975_v62  ;;  %2587 = vmatprep.subr.bf16.mxu1 %v4978_v63  ;;  %v5062_v62 = vld [vmem:[#allocation8 + $0x8c] ss:$16 sps:$4 sm:$0xff]   ;;  %v5057_v63 = vld [vmem:[#allocation8 + $0x80] ss:$16 sps:$4 sm:$0xff]  }
 0x21a   :  { %2506 = vmatpush1.bf16.msra.mxu0 %v4973_v0  ;;  %2588 = vmatpush1.bf16.msra.mxu1 %v4976_v1  ;;  %v5060_v0 = vld [vmem:[#allocation8 + $0x88] ss:$16 sps:$4 sm:$0xff]   ;;  %v5065_v1 = vld [vmem:[#allocation8 + $0xa4] ss:$16 sps:$4 sm:$0xff]  }
 0x21b   :  { %2507 = vmatprep.subr.bf16.mxu0 %v4981_v2  ;;  %2589 = vmatprep.subr.bf16.mxu1 %v4984_v3  ;;  %v5068_v2 = vld [vmem:[#allocation8 + $0xac] ss:$16 sps:$4 sm:$0xff]   ;;  %v5063_v3 = vld [vmem:[#allocation8 + $0xa0] ss:$16 sps:$4 sm:$0xff]  }
 0x21e   :  { %2508 = vmatpush1.bf16.msra.mxu0 %v4979_v4  ;;  %2590 = vmatpush1.bf16.msra.mxu1 %v4982_v5  ;;  %v5066_v4 = vld [vmem:[#allocation8 + $0xa8] ss:$16 sps:$4 sm:$0xff]   ;;  %v5071_v5 = vld [vmem:[#allocation8 + $0xc4] ss:$16 sps:$4 sm:$0xff]  }
 0x21f   :  { %2509 = vmatprep.subr.bf16.mxu0 %v4987_v6  ;;  %2591 = vmatprep.subr.bf16.mxu1 %v4990_v7  ;;  %v5074_v6 = vld [vmem:[#allocation8 + $0xcc] ss:$16 sps:$4 sm:$0xff]   ;;  %v5069_v7 = vld [vmem:[#allocation8 + $0xc0] ss:$16 sps:$4 sm:$0xff]  }
 0x222   :  { %2510 = vmatpush1.bf16.msra.mxu0 %v4985_v8  ;;  %2592 = vmatpush1.bf16.msra.mxu1 %v4988_v9  ;;  %v5072_v8 = vld [vmem:[#allocation8 + $0xc8] ss:$16 sps:$4 sm:$0xff]   ;;  %v5077_v9 = vld [vmem:[#allocation8 + $0xe4] ss:$16 sps:$4 sm:$0xff]  }
 0x223   :  { %2511 = vmatprep.subr.bf16.mxu0 %v4993_v10  ;;  %2593 = vmatprep.subr.bf16.mxu1 %v4996_v12  ;;  %v5080_v10 = vld [vmem:[#allocation8 + $0xec] ss:$16 sps:$4 sm:$0xff]   ;;  %v5075_v12 = vld [vmem:[#allocation8 + $0xe0] ss:$16 sps:$4 sm:$0xff]  }
 0x226   :  { %2512 = vmatpush1.bf16.msra.mxu0 %v4991_v13  ;;  %2594 = vmatpush1.bf16.msra.mxu1 %v4994_v14  ;;  %v5078_v13 = vld [vmem:[#allocation8 + $0xe8] ss:$16 sps:$4 sm:$0xff]   ;;  %v5083_v14 = vld [vmem:[#allocation8 + $0x104] ss:$16 sps:$4 sm:$0xff]  }
 0x227   :  { %2513 = vmatprep.subr.bf16.mxu0 %v4999_v15  ;;  %2595 = vmatprep.subr.bf16.mxu1 %v5002_v16  ;;  %v5086_v15 = vld [vmem:[#allocation8 + $0x10c] ss:$16 sps:$4 sm:$0xff]   ;;  %v5081_v16 = vld [vmem:[#allocation8 + $0x100] ss:$16 sps:$4 sm:$0xff]  }
 0x22a   :  { %2514 = vmatpush1.bf16.msra.mxu0 %v4997_v17  ;;  %2596 = vmatpush1.bf16.msra.mxu1 %v5000_v18  ;;  %v5084_v17 = vld [vmem:[#allocation8 + $0x108] ss:$16 sps:$4 sm:$0xff]   ;;  %v5089_v18 = vld [vmem:[#allocation8 + $0x124] ss:$16 sps:$4 sm:$0xff]  }
 0x22b   :  { %2515 = vmatprep.subr.bf16.mxu0 %v5005_v23  ;;  %2597 = vmatprep.subr.bf16.mxu1 %v5008_v24  ;;  %v5092_v23 = vld [vmem:[#allocation8 + $0x12c] ss:$16 sps:$4 sm:$0xff]   ;;  %v5087_v24 = vld [vmem:[#allocation8 + $0x120] ss:$16 sps:$4 sm:$0xff]  }
 0x22e   :  { %2516 = vmatpush1.bf16.msra.mxu0 %v5003_v25  ;;  %2598 = vmatpush1.bf16.msra.mxu1 %v5006_v26  ;;  %v5090_v25 = vld [vmem:[#allocation8 + $0x128] ss:$16 sps:$4 sm:$0xff]   ;;  %v5095_v26 = vld [vmem:[#allocation8 + $0x144] ss:$16 sps:$4 sm:$0xff]  }
 0x22f   :  { %2517 = vmatprep.subr.bf16.mxu0 %v5011_v28  ;;  %2599 = vmatprep.subr.bf16.mxu1 %v5014_v29  ;;  %v5098_v28 = vld [vmem:[#allocation8 + $0x14c] ss:$16 sps:$4 sm:$0xff]   ;;  %v5093_v29 = vld [vmem:[#allocation8 + $0x140] ss:$16 sps:$4 sm:$0xff]  }
 0x232   :  { %2518 = vmatpush1.bf16.msra.mxu0 %v5009_v30  ;;  %2600 = vmatpush1.bf16.msra.mxu1 %v5012_v31  ;;  %v5096_v30 = vld [vmem:[#allocation8 + $0x148] ss:$16 sps:$4 sm:$0xff]   ;;  %v5101_v31 = vld [vmem:[#allocation8 + $0x164] ss:$16 sps:$4 sm:$0xff]  }
 0x233   :  { %2519 = vmatprep.subr.bf16.mxu0 %v5017_v32  ;;  %2601 = vmatprep.subr.bf16.mxu1 %v5020_v33  ;;  %v5104_v32 = vld [vmem:[#allocation8 + $0x16c] ss:$16 sps:$4 sm:$0xff]   ;;  %v5099_v33 = vld [vmem:[#allocation8 + $0x160] ss:$16 sps:$4 sm:$0xff]  }
 0x236   :  { %2520 = vmatpush1.bf16.msra.mxu0 %v5015_v34  ;;  %2602 = vmatpush1.bf16.msra.mxu1 %v5018_v35  ;;  %v5102_v34 = vld [vmem:[#allocation8 + $0x168] ss:$16 sps:$4 sm:$0xff]   ;;  %v5107_v35 = vld [vmem:[#allocation8 + $0x184] ss:$16 sps:$4 sm:$0xff]  }
 0x237   :  { %2521 = vmatprep.subr.bf16.mxu0 %v5023_v37  ;;  %2603 = vmatprep.subr.bf16.mxu1 %v5026_v38  ;;  %v5110_v37 = vld [vmem:[#allocation8 + $0x18c] ss:$16 sps:$4 sm:$0xff]   ;;  %v5105_v38 = vld [vmem:[#allocation8 + $0x180] ss:$16 sps:$4 sm:$0xff]  }
 0x23a   :  { %2522 = vmatpush1.bf16.msra.mxu0 %v5021_v39  ;;  %2604 = vmatpush1.bf16.msra.mxu1 %v5024_v40  ;;  %v5108_v39 = vld [vmem:[#allocation8 + $0x188] ss:$16 sps:$4 sm:$0xff]   ;;  %v5113_v40 = vld [vmem:[#allocation8 + $0x1a4] ss:$16 sps:$4 sm:$0xff]  }
 0x23b   :  { %2523 = vmatprep.subr.bf16.mxu0 %v5029_v42  ;;  %2605 = vmatprep.subr.bf16.mxu1 %v5032_v43  ;;  %v5111_v42 = vld [vmem:[#allocation8 + $0x1a0] ss:$16 sps:$4 sm:$0xff]   ;;  %v5114_v43 = vld [vmem:[#allocation8 + $0x1a8] ss:$16 sps:$4 sm:$0xff]  }
 0x23e   :  { %2524 = vmatpush1.bf16.msra.mxu0 %v5027_v44  ;;  %2606 = vmatpush1.bf16.msra.mxu1 %v5030_v19  ;;  %v5119_v44 = vld [vmem:[#allocation8 + $0x1c4] ss:$16 sps:$4 sm:$0xff]   ;;  %v5122_v19 = vld [vmem:[#allocation8 + $0x1cc] ss:$16 sps:$4 sm:$0xff]  }
 0x23f   :  { %3410 = vmatprep.subr.bf16.mxu0 %v5035_v46  ;;  %3492 = vmatprep.subr.bf16.mxu1 %v5038_v47  ;;  %v5120_v46 = vld [vmem:[#allocation8 + $0x1c8] ss:$16 sps:$4 sm:$0xff]   ;;  %v5125_v47 = vld [vmem:[#allocation8 + $0x1e4] ss:$16 sps:$4 sm:$0xff]  }
 0x241   :  { %2526 = vmatmul.mubr.bf16.vlgmr.msra.gmra.mrb[4].mxu0 %v1660_v50  ;;  %2608 = vmatmul.mubr.bf16.vlgmr.msra.gmra.mrb[4].mxu1 %v1660_v50  ;;  %v5126_v50 = vld [vmem:[#allocation8 + $0x1e8] ss:$16 sps:$4 sm:$0xff]  }
 0x242   :  { %3411 = vmatpush1.bf16.msra.mxu0 %v5033_v48  ;;  %3493 = vmatpush1.bf16.msra.mxu1 %v5036_v49  ;;  %v5128_v48 = vld [vmem:[#allocation8 + $0x1ec] ss:$16 sps:$4 sm:$0xff]   ;;  %v5123_v49 = vld [vmem:[#allocation8 + $0x1e0] ss:$16 sps:$4 sm:$0xff]  }
 0x243   :  { %3412 = vmatprep.subr.bf16.mxu0 %v5041_v11  ;;  %3494 = vmatprep.subr.bf16.mxu1 %v5044_v51  ;;  %v5131_v11 = vld [vmem:[#allocation8 + $0x204] ss:$16 sps:$4 sm:$0xff]   ;;  %v5134_v51 = vld [vmem:[#allocation8 + $0x20c] ss:$16 sps:$4 sm:$0xff]  }
 0x246   :  { %3413 = vmatpush1.bf16.msra.mxu0 %v5039_v52  ;;  %3495 = vmatpush1.bf16.msra.mxu1 %v5042_v53  ;;  %v5572_v52 = vld [vmem:[%s5611_s4] sm:$0xf] }
 0x247   :  { %3414 = vmatprep.subr.bf16.mxu0 %v5047_v27  ;;  %3496 = vmatprep.subr.bf16.mxu1 %v5050_v54  ;;  %v1795_v53 = vrot.slane %v5572_v52, %v5542_v20  ;;  %v1799_v27 = vrot.slane %v5572_v52, %v5550_v21  ;;  %v1807_v54 = vrot.slane %v5572_v52, %v5553_v22 }
 0x24a   :  { %3415 = vmatpush1.bf16.msra.mxu0 %v5045_v55  ;;  %3497 = vmatpush1.bf16.msra.mxu1 %v5048_v56 }
 0x24b   :  { %3416 = vmatprep.subr.bf16.mxu0 %v5053_v57  ;;  %3498 = vmatprep.subr.bf16.mxu1 %v5056_v58 }
 0x24e   :  { %3417 = vmatpush1.bf16.msra.mxu0 %v5051_v59  ;;  %3499 = vmatpush1.bf16.msra.mxu1 %v5054_v60 }
 0x24f   :  { %3418 = vmatprep.subr.bf16.mxu0 %v5059_v61  ;;  %3500 = vmatprep.subr.bf16.mxu1 %v5062_v62 }
 0x252   :  { %3419 = vmatpush1.bf16.msra.mxu0 %v5057_v63  ;;  %3501 = vmatpush1.bf16.msra.mxu1 %v5060_v0 }
 0x253   :  { %3420 = vmatprep.subr.bf16.mxu0 %v5065_v1  ;;  %3502 = vmatprep.subr.bf16.mxu1 %v5068_v2 }
 0x256   :  { %3421 = vmatpush1.bf16.msra.mxu0 %v5063_v3  ;;  %3503 = vmatpush1.bf16.msra.mxu1 %v5066_v4  ;;  %v5129_v3 = vld [vmem:[#allocation8 + $0x200] ss:$16 sps:$4 sm:$0xff]   ;;  %v5132_v4 = vld [vmem:[#allocation8 + $0x208] ss:$16 sps:$4 sm:$0xff]  }
 0x257   :  { %3422 = vmatprep.subr.bf16.mxu0 %v5071_v5  ;;  %3504 = vmatprep.subr.bf16.mxu1 %v5074_v6  ;;  %v5137_v6 = vld [vmem:[#allocation8 + $0x224] ss:$16 sps:$4 sm:$0xff]  }
 0x25a   :  { %3423 = vmatpush1.bf16.msra.mxu0 %v5069_v7  ;;  %3505 = vmatpush1.bf16.msra.mxu1 %v5072_v8  ;;  %v5140_v7 = vld [vmem:[#allocation8 + $0x22c] ss:$16 sps:$4 sm:$0xff]  }
 0x25b   :  { %3424 = vmatprep.subr.bf16.mxu0 %v5077_v9  ;;  %3506 = vmatprep.subr.bf16.mxu1 %v5080_v10  ;;  %v5135_v9 = vld [vmem:[#allocation8 + $0x220] ss:$16 sps:$4 sm:$0xff]   ;;  %v5138_v10 = vld [vmem:[#allocation8 + $0x228] ss:$16 sps:$4 sm:$0xff]  }
 0x25e   :  { %3425 = vmatpush1.bf16.msra.mxu0 %v5075_v12  ;;  %3507 = vmatpush1.bf16.msra.mxu1 %v5078_v13  ;;  %v5143_v12 = vld [vmem:[#allocation8 + $0x244] ss:$16 sps:$4 sm:$0xff]   ;;  %v5146_v13 = vld [vmem:[#allocation8 + $0x24c] ss:$16 sps:$4 sm:$0xff]  }
 0x25f   :  { %3426 = vmatprep.subr.bf16.mxu0 %v5083_v14  ;;  %3508 = vmatprep.subr.bf16.mxu1 %v5086_v15  ;;  %v5141_v14 = vld [vmem:[#allocation8 + $0x240] ss:$16 sps:$4 sm:$0xff]   ;;  %v5144_v15 = vld [vmem:[#allocation8 + $0x248] ss:$16 sps:$4 sm:$0xff]  }
 0x262   :  { %3427 = vmatpush1.bf16.msra.mxu0 %v5081_v16  ;;  %3509 = vmatpush1.bf16.msra.mxu1 %v5084_v17  ;;  %v5149_v16 = vld [vmem:[#allocation8 + $0x264] ss:$16 sps:$4 sm:$0xff]   ;;  %v5152_v17 = vld [vmem:[#allocation8 + $0x26c] ss:$16 sps:$4 sm:$0xff]  }
 0x263   :  { %3428 = vmatprep.subr.bf16.mxu0 %v5089_v18  ;;  %3510 = vmatprep.subr.bf16.mxu1 %v5092_v23  ;;  %v5147_v18 = vld [vmem:[#allocation8 + $0x260] ss:$16 sps:$4 sm:$0xff]   ;;  %v5150_v23 = vld [vmem:[#allocation8 + $0x268] ss:$16 sps:$4 sm:$0xff]  }
 0x266   :  { %3429 = vmatpush1.bf16.msra.mxu0 %v5087_v24  ;;  %3511 = vmatpush1.bf16.msra.mxu1 %v5090_v25  ;;  %v5155_v24 = vld [vmem:[#allocation8 + $0x284] ss:$16 sps:$4 sm:$0xff]   ;;  %v5158_v25 = vld [vmem:[#allocation8 + $0x28c] ss:$16 sps:$4 sm:$0xff]  }
 0x267   :  { %3430 = vmatprep.subr.bf16.mxu0 %v5095_v26  ;;  %3512 = vmatprep.subr.bf16.mxu1 %v5098_v28  ;;  %v5153_v26 = vld [vmem:[#allocation8 + $0x280] ss:$16 sps:$4 sm:$0xff]   ;;  %v5156_v28 = vld [vmem:[#allocation8 + $0x288] ss:$16 sps:$4 sm:$0xff]  }
 0x26a   :  { %3431 = vmatpush1.bf16.msra.mxu0 %v5093_v29  ;;  %3513 = vmatpush1.bf16.msra.mxu1 %v5096_v30  ;;  %v5161_v29 = vld [vmem:[#allocation8 + $0x2a4] ss:$16 sps:$4 sm:$0xff]   ;;  %v5164_v30 = vld [vmem:[#allocation8 + $0x2ac] ss:$16 sps:$4 sm:$0xff]  }
 0x26b   :  { %3432 = vmatprep.subr.bf16.mxu0 %v5101_v31  ;;  %3514 = vmatprep.subr.bf16.mxu1 %v5104_v32  ;;  %v5159_v31 = vld [vmem:[#allocation8 + $0x2a0] ss:$16 sps:$4 sm:$0xff]   ;;  %v5162_v32 = vld [vmem:[#allocation8 + $0x2a8] ss:$16 sps:$4 sm:$0xff]  }
 0x26e   :  { %3433 = vmatpush1.bf16.msra.mxu0 %v5099_v33  ;;  %3515 = vmatpush1.bf16.msra.mxu1 %v5102_v34  ;;  %v5167_v33 = vld [vmem:[#allocation8 + $0x2c4] ss:$16 sps:$4 sm:$0xff]   ;;  %v5170_v34 = vld [vmem:[#allocation8 + $0x2cc] ss:$16 sps:$4 sm:$0xff]  }
 0x26f   :  { %3434 = vmatprep.subr.bf16.mxu0 %v5107_v35  ;;  %3516 = vmatprep.subr.bf16.mxu1 %v5110_v37  ;;  %v5165_v35 = vld [vmem:[#allocation8 + $0x2c0] ss:$16 sps:$4 sm:$0xff]   ;;  %v5168_v37 = vld [vmem:[#allocation8 + $0x2c8] ss:$16 sps:$4 sm:$0xff]  }
 0x272   :  { %3435 = vmatpush1.bf16.msra.mxu0 %v5105_v38  ;;  %3517 = vmatpush1.bf16.msra.mxu1 %v5108_v39  ;;  %v5173_v38 = vld [vmem:[#allocation8 + $0x2e4] ss:$16 sps:$4 sm:$0xff]   ;;  %v5176_v39 = vld [vmem:[#allocation8 + $0x2ec] ss:$16 sps:$4 sm:$0xff]  }
 0x273   :  { %3436 = vmatprep.subr.bf16.mxu0 %v5113_v40  ;;  %3518 = vmatprep.subr.bf16.mxu1 %v5116_v41  ;;  %v5171_v40 = vld [vmem:[#allocation8 + $0x2e0] ss:$16 sps:$4 sm:$0xff]   ;;  %v5174_v41 = vld [vmem:[#allocation8 + $0x2e8] ss:$16 sps:$4 sm:$0xff]  }
 0x276   :  { %3437 = vmatpush1.bf16.msra.mxu0 %v5111_v42  ;;  %3519 = vmatpush1.bf16.msra.mxu1 %v5114_v43  ;;  %v5179_v42 = vld [vmem:[#allocation8 + $0x304] ss:$16 sps:$4 sm:$0xff]   ;;  %v5182_v43 = vld [vmem:[#allocation8 + $0x30c] ss:$16 sps:$4 sm:$0xff]  }
 0x277   :  { %3438 = vmatprep.subr.bf16.mxu0 %v5119_v44  ;;  %3520 = vmatprep.subr.bf16.mxu1 %v5122_v19  ;;  %v5177_v44 = vld [vmem:[#allocation8 + $0x300] ss:$16 sps:$4 sm:$0xff]   ;;  %v5180_v19 = vld [vmem:[#allocation8 + $0x308] ss:$16 sps:$4 sm:$0xff]  }
 0x27a   :  { %3439 = vmatpush1.bf16.msra.mxu0 %v5117_v45  ;;  %3521 = vmatpush1.bf16.msra.mxu1 %v5120_v46  ;;  %v5185_v45 = vld [vmem:[#allocation8 + $0x324] ss:$16 sps:$4 sm:$0xff]   ;;  %v5188_v46 = vld [vmem:[#allocation8 + $0x32c] ss:$16 sps:$4 sm:$0xff]  }
 0x27b   :  { %3440 = vmatprep.subr.bf16.mxu0 %v5125_v47  ;;  %3522 = vmatprep.subr.bf16.mxu1 %v5128_v48  ;;  %v5183_v47 = vld [vmem:[#allocation8 + $0x320] ss:$16 sps:$4 sm:$0xff]   ;;  %v5186_v48 = vld [vmem:[#allocation8 + $0x328] ss:$16 sps:$4 sm:$0xff]  }
 0x27e   :  { %3441 = vmatpush1.bf16.msra.mxu0 %v5123_v49  ;;  %3523 = vmatpush1.bf16.msra.mxu1 %v5126_v50  ;;  %v5191_v49 = vld [vmem:[#allocation8 + $0x344] ss:$16 sps:$4 sm:$0xff]   ;;  %v5194_v50 = vld [vmem:[#allocation8 + $0x34c] ss:$16 sps:$4 sm:$0xff]  }
 0x27f   :  { %3451 = vmatprep.subr.bf16.mxu0 %v5131_v11  ;;  %3533 = vmatprep.subr.bf16.mxu1 %v5134_v51  ;;  %v5189_v11 = vld [vmem:[#allocation8 + $0x340] ss:$16 sps:$4 sm:$0xff]   ;;  %v5192_v51 = vld [vmem:[#allocation8 + $0x348] ss:$16 sps:$4 sm:$0xff]  }
 0x314   :  { %v2527_v55 = vpop.f32.mrb[4].mxu0  ;;  %v5580_v56 = vpop.f32.mrb[4].mxu1 }
 0x315   :  { %v4481_v57 = vadd.f32 %v2527_v55, %v1795_v53  ;;  %v2529_v58 = vpop.f32.mrb[5].mxu0  ;;  %v2611_v59 = vpop.f32.mrb[5].mxu1  ;;  %v5197_v53 = vld [vmem:[#allocation8 + $0x364] ss:$16 sps:$4 sm:$0xff]   ;;  %v5198_v55 = vld [vmem:[#allocation8 + $0x368] ss:$16 sps:$4 sm:$0xff]  }
 0x316   :  { %v4482_v60 = vadd.f32 %v2529_v58, %v1799_v27  ;;  %v2531_v61 = vpop.f32.mrb[6].mxu0  ;;  %v2613_v62 = vpop.f32.mrb[6].mxu1  ;;  %v4484_v63 = vadd.f32 %v2611_v59, %v1807_v54  ;;  %v5200_v27 = vld [vmem:[#allocation8 + $0x36c] ss:$16 sps:$4 sm:$0xff]   ;;  %v5195_v54 = vld [vmem:[#allocation8 + $0x360] ss:$16 sps:$4 sm:$0xff]  }
 0x317   :  { %v2532_v0 = vpop.f32.mrb[7].mxu0  ;;  %v2614_v1 = vpop.f32.mrb[7].mxu1  ;;  %v2616_v5 = vpack.c.bf16 %v4481_v57, %v4481_v57  ;;  %v5203_v57 = vld [vmem:[#allocation8 + $0x384] ss:$16 sps:$4 sm:$0xff]   ;;  %v5206_v58 = vld [vmem:[#allocation8 + $0x38c] ss:$16 sps:$4 sm:$0xff]  }
 0x318   :  { %v2617_v2 = vpack.c.bf16 %v4482_v60, %v4482_v60  ;;  %v2619_v8 = vpack.c.bf16 %v4484_v63, %v4484_v63  ;;  %v5201_v59 = vld [vmem:[#allocation8 + $0x380] ss:$16 sps:$4 sm:$0xff]   ;;  %v5204_v60 = vld [vmem:[#allocation8 + $0x388] ss:$16 sps:$4 sm:$0xff]   ;;  %v5209_v61 = vld [vmem:[#allocation8 + $0x3a4] ss:$16 sps:$4 sm:$0xff]  }
 0x319   :  { %v5212_v62 = vld [vmem:[#allocation8 + $0x3ac] ss:$16 sps:$4 sm:$0xff]   ;;  %v5207_v63 = vld [vmem:[#allocation8 + $0x3a0] ss:$16 sps:$4 sm:$0xff]   ;;  %v5210_v0 = vld [vmem:[#allocation8 + $0x3a8] ss:$16 sps:$4 sm:$0xff]  }
 0x31a   :  { %3442 = vmatprep.mubr.bf16.mxu0 %v2617_v2  ;;  %3524 = vmatprep.mubr.bf16.mxu1 %v2617_v2  ;;  %v5215_v1 = vld [vmem:[#allocation8 + $0x3c4] ss:$16 sps:$4 sm:$0xff]   ;;  %v5218_v2 = vld [vmem:[#allocation8 + $0x3cc] ss:$16 sps:$4 sm:$0xff]  }
 0x31b   :  { %3443 = vmatmul.mubr.bf16.vlgmr.msra.gmra.mrb[8].mxu0 %v2616_v5  ;;  %3525 = vmatmul.mubr.bf16.vlgmr.msra.gmra.mrb[8].mxu1 %v2616_v5  ;;  %v1803_v5 = vrot.slane %v5572_v52, %v5564_v36  ;;  %v5229_v52 = vld [vmem:[#allocation10 + $0x48] sm:$0xff]  }
 0x31c   :  { %3452 = vmatpush1.bf16.msra.mxu0 %v5129_v3  ;;  %3534 = vmatpush1.bf16.msra.mxu1 %v5132_v4  ;;  %v5213_v3 = vld [vmem:[#allocation8 + $0x3c0] ss:$16 sps:$4 sm:$0xff]   ;;  %v5216_v4 = vld [vmem:[#allocation8 + $0x3c8] ss:$16 sps:$4 sm:$0xff]  }
 0x31d   :  { %3483 = vmatprep.mubr.bf16.mxu0 %v2619_v8  ;;  %3565 = vmatprep.mubr.bf16.mxu1 %v2619_v8  ;;  %v5219_v8 = vld [vmem:[#allocation8 + $0x3e0] ss:$16 sps:$4 sm:$0xff]  }
 0x31e   :  { %3453 = vmatprep.subr.bf16.mxu0 %v5137_v6  ;;  %3535 = vmatprep.subr.bf16.mxu1 %v5140_v7  ;;  %v5221_v6 = vld [vmem:[#allocation8 + $0x3e4] ss:$16 sps:$4 sm:$0xff]   ;;  %v5224_v7 = vld [vmem:[#allocation8 + $0x3ec] ss:$16 sps:$4 sm:$0xff]  }
 0x320   :  { %3454 = vmatpush1.bf16.msra.mxu0 %v5135_v9  ;;  %3536 = vmatpush1.bf16.msra.mxu1 %v5138_v10  ;;  %v5222_v9 = vld [vmem:[#allocation8 + $0x3e8] ss:$16 sps:$4 sm:$0xff]   ;;  %v4483_v10 = vadd.f32 %v5580_v56, %v1803_v5  ;;  %v5233_v56 = vld [vmem:[#allocation10 + $0x50] sm:$0xff]  }
 0x321   :  { %3455 = vmatprep.subr.bf16.mxu0 %v5143_v12  ;;  %3537 = vmatprep.subr.bf16.mxu1 %v5146_v13  ;;  %v5225_v12 = vld [vmem:[#allocation10 + $0x40] sm:$0xff]  }
 0x322   :  { %v5226_v13 = vld [vmem:[#allocation10 + $0xc0] sm:$0xff]  }
 0x324   :  { %3456 = vmatpush1.bf16.msra.mxu0 %v5141_v14  ;;  %3538 = vmatpush1.bf16.msra.mxu1 %v5144_v15  ;;  %v5227_v14 = vld [vmem:[#allocation10] sm:$0xff]  }
 0x325   :  { %3457 = vmatprep.subr.bf16.mxu0 %v5149_v16  ;;  %3539 = vmatprep.subr.bf16.mxu1 %v5152_v17  ;;  %v5228_v15 = vld [vmem:[#allocation10 + $0x80] sm:$0xff]   ;;  %v2618_v16 = vpack.c.bf16 %v4483_v10, %v4483_v10  ;;  %v5230_v17 = vld [vmem:[#allocation10 + $0xc8] sm:$0xff]  }
 0x328   :  { %3458 = vmatpush1.bf16.msra.mxu0 %v5147_v18  ;;  %3540 = vmatpush1.bf16.msra.mxu1 %v5150_v23  ;;  %v5231_v18 = vld [vmem:[#allocation10 + $0x8] sm:$0xff]  }
 0x329   :  { %3459 = vmatprep.subr.bf16.mxu0 %v5155_v24  ;;  %3541 = vmatprep.subr.bf16.mxu1 %v5158_v25  ;;  %v5232_v23 = vld [vmem:[#allocation10 + $0x88] sm:$0xff]   ;;  %v5234_v24 = vld [vmem:[#allocation10 + $0xd0] sm:$0xff]  }
 0x32a   :  { %v5235_v25 = vld [vmem:[#allocation10 + $0x10] sm:$0xff]  }
 0x32c   :  { %3460 = vmatpush1.bf16.msra.mxu0 %v5153_v26  ;;  %3542 = vmatpush1.bf16.msra.mxu1 %v5156_v28  ;;  %v5236_v26 = vld [vmem:[#allocation10 + $0x90] sm:$0xff]   ;;  %v5237_v28 = vld [vmem:[#allocation10 + $0x58] sm:$0xff]  }
 0x32d   :  { %3461 = vmatprep.subr.bf16.mxu0 %v5161_v29  ;;  %3543 = vmatprep.subr.bf16.mxu1 %v5164_v30  ;;  %v5238_v29 = vld [vmem:[#allocation10 + $0xd8] sm:$0xff]  }
 0x32e   :  { %v5239_v30 = vld [vmem:[#allocation10 + $0x18] sm:$0xff]  }
 0x330   :  { %3462 = vmatpush1.bf16.msra.mxu0 %v5159_v31  ;;  %3544 = vmatpush1.bf16.msra.mxu1 %v5162_v32  ;;  %v5240_v31 = vld [vmem:[#allocation10 + $0x98] sm:$0xff]   ;;  %v5241_v32 = vld [vmem:[#allocation10 + $0x60] sm:$0xff]  }
 0x331   :  { %3463 = vmatprep.subr.bf16.mxu0 %v5167_v33  ;;  %3545 = vmatprep.subr.bf16.mxu1 %v5170_v34  ;;  %v5242_v33 = vld [vmem:[#allocation10 + $0xe0] sm:$0xff]  }
 0x332   :  { %v5243_v34 = vld [vmem:[#allocation10 + $0x20] sm:$0xff]  }
 0x334   :  { %3464 = vmatpush1.bf16.msra.mxu0 %v5165_v35  ;;  %3546 = vmatpush1.bf16.msra.mxu1 %v5168_v37  ;;  %v5244_v35 = vld [vmem:[#allocation10 + $0xa0] sm:$0xff]   ;;  %v5245_v37 = vld [vmem:[#allocation10 + $0x68] sm:$0xff]  }
 0x335   :  { %3465 = vmatprep.subr.bf16.mxu0 %v5173_v38  ;;  %3547 = vmatprep.subr.bf16.mxu1 %v5176_v39  ;;  %v5246_v38 = vld [vmem:[#allocation10 + $0xe8] sm:$0xff]  }
 0x336   :  { %v5247_v39 = vld [vmem:[#allocation10 + $0x28] sm:$0xff]  }
 0x338   :  { %3466 = vmatpush1.bf16.msra.mxu0 %v5171_v40  ;;  %3548 = vmatpush1.bf16.msra.mxu1 %v5174_v41  ;;  %v5248_v40 = vld [vmem:[#allocation10 + $0xa8] sm:$0xff]   ;;  %v5249_v41 = vld [vmem:[#allocation10 + $0x70] sm:$0xff]  }
 0x339   :  { %3467 = vmatprep.subr.bf16.mxu0 %v5179_v42  ;;  %3549 = vmatprep.subr.bf16.mxu1 %v5182_v43  ;;  %v5250_v42 = vld [vmem:[#allocation10 + $0xf0] sm:$0xff]  }
 0x33a   :  { %v5251_v43 = vld [vmem:[#allocation10 + $0x30] sm:$0xff]  }
 0x33c   :  { %3468 = vmatpush1.bf16.msra.mxu0 %v5177_v44  ;;  %3550 = vmatpush1.bf16.msra.mxu1 %v5180_v19  ;;  %v5252_v44 = vld [vmem:[#allocation10 + $0xb0] sm:$0xff]   ;;  %v5253_v19 = vld [vmem:[#allocation10 + $0x78] sm:$0xff]  }
 0x33d   :  { %3469 = vmatprep.subr.bf16.mxu0 %v5185_v45  ;;  %3551 = vmatprep.subr.bf16.mxu1 %v5188_v46  ;;  %v5254_v45 = vld [vmem:[#allocation10 + $0xf8] sm:$0xff]  }
 0x33e   :  { %v5255_v46 = vld [vmem:[#allocation10 + $0x38] sm:$0xff]  }
 0x340   :  { %3470 = vmatpush1.bf16.msra.mxu0 %v5183_v47  ;;  %3552 = vmatpush1.bf16.msra.mxu1 %v5186_v48  ;;  %v5256_v47 = vld [vmem:[#allocation10 + $0xb8] sm:$0xff]   ;;  %v2748_v48 = vld [vmem:[%s5613_s6] sm:$0xf] }
 0x341   :  { %3471 = vmatprep.subr.bf16.mxu0 %v5191_v49  ;;  %3553 = vmatprep.subr.bf16.mxu1 %v5194_v50  ;;  %v2753_v49 = vrot.slane %v2748_v48, %v5542_v20  ;;  %v2761_v50 = vrot.slane %v2748_v48, %v5564_v36 }
 0x344   :  { %3472 = vmatpush1.bf16.msra.mxu0 %v5189_v11  ;;  %3554 = vmatpush1.bf16.msra.mxu1 %v5192_v51  ;;  %v2757_v11 = vrot.slane %v2748_v48, %v5550_v21  ;;  %v2765_v51 = vrot.slane %v2748_v48, %v5553_v22 }
 0x345   :  { %3473 = vmatprep.subr.bf16.mxu0 %v5197_v53  ;;  %3555 = vmatprep.subr.bf16.mxu1 %v5200_v27 }
 0x348   :  { %3474 = vmatpush1.bf16.msra.mxu0 %v5195_v54  ;;  %3556 = vmatpush1.bf16.msra.mxu1 %v5198_v55 }
 0x349   :  { %3475 = vmatprep.subr.bf16.mxu0 %v5203_v57  ;;  %3557 = vmatprep.subr.bf16.mxu1 %v5206_v58 }
 0x34c   :  { %3476 = vmatpush1.bf16.msra.mxu0 %v5201_v59  ;;  %3558 = vmatpush1.bf16.msra.mxu1 %v5204_v60 }
 0x34d   :  { %3477 = vmatprep.subr.bf16.mxu0 %v5209_v61  ;;  %3559 = vmatprep.subr.bf16.mxu1 %v5212_v62 }
 0x350   :  { %3478 = vmatpush1.bf16.msra.mxu0 %v5207_v63  ;;  %3560 = vmatpush1.bf16.msra.mxu1 %v5210_v0 }
 0x351   :  { %3479 = vmatprep.subr.bf16.mxu0 %v5215_v1  ;;  %3561 = vmatprep.subr.bf16.mxu1 %v5218_v2 }
 0x354   :  { %3480 = vmatpush1.bf16.msra.mxu0 %v5213_v3  ;;  %3562 = vmatpush1.bf16.msra.mxu1 %v5216_v4  ;;  %v4400_v3 = vld [vmem:[%s5615_s8] ss:$0 sm:$0xff] }
 0x355   :  { %3481 = vmatprep.subr.bf16.mxu0 %v5221_v6  ;;  %3563 = vmatprep.subr.bf16.mxu1 %v5224_v7 }
 0x358   :  { %3482 = vmatpush1.bf16.msra.mxu0 %v5219_v8  ;;  %3564 = vmatpush1.bf16.msra.mxu1 %v5222_v9 }
 0x359   :  { %4433 = vmatprep.subr.bf16.mxu0 %v5225_v12  ;;  %4455 = vmatprep.subr.bf16.mxu1 %v5226_v13 }
 0x35b   :  { %3484 = vmatmul.mubr.bf16.vlgmr.msra.gmra.mrb[8].mxu0 %v2618_v16  ;;  %3566 = vmatmul.mubr.bf16.vlgmr.msra.gmra.mrb[8].mxu1 %v2618_v16 }
 0x35c   :  { %4434 = vmatpush3.bf16.msra.mxu0 %v5227_v14  ;;  %4456 = vmatpush3.bf16.msra.mxu1 %v5228_v15 }
 0x35d   :  { %4435 = vmatprep.subr.bf16.mxu0 %v5229_v52  ;;  %4457 = vmatprep.subr.bf16.mxu1 %v5230_v17 }
 0x360   :  { %4436 = vmatpush3.bf16.msra.mxu0 %v5231_v18  ;;  %4458 = vmatpush3.bf16.msra.mxu1 %v5232_v23 }
 0x361   :  { %4437 = vmatprep.subr.bf16.mxu0 %v5233_v56  ;;  %4459 = vmatprep.subr.bf16.mxu1 %v5234_v24 }
 0x364   :  { %4438 = vmatpush3.bf16.msra.mxu0 %v5235_v25  ;;  %4460 = vmatpush3.bf16.msra.mxu1 %v5236_v26 }
 0x365   :  { %4439 = vmatprep.subr.bf16.mxu0 %v5237_v28  ;;  %4461 = vmatprep.subr.bf16.mxu1 %v5238_v29 }
 0x368   :  { %4440 = vmatpush3.bf16.msra.mxu0 %v5239_v30  ;;  %4462 = vmatpush3.bf16.msra.mxu1 %v5240_v31 }
 0x369   :  { %4441 = vmatprep.subr.bf16.mxu0 %v5241_v32  ;;  %4463 = vmatprep.subr.bf16.mxu1 %v5242_v33 }
 0x36c   :  { %4442 = vmatpush3.bf16.msra.mxu0 %v5243_v34  ;;  %4464 = vmatpush3.bf16.msra.mxu1 %v5244_v35 }
 0x36d   :  { %4443 = vmatprep.subr.bf16.mxu0 %v5245_v37  ;;  %4465 = vmatprep.subr.bf16.mxu1 %v5246_v38 }
 0x370   :  { %4444 = vmatpush3.bf16.msra.mxu0 %v5247_v39  ;;  %4466 = vmatpush3.bf16.msra.mxu1 %v5248_v40 }
 0x371   :  { %4445 = vmatprep.subr.bf16.mxu0 %v5249_v41  ;;  %4467 = vmatprep.subr.bf16.mxu1 %v5250_v42 }
 0x374   :  { %4446 = vmatpush3.bf16.msra.mxu0 %v5251_v43  ;;  %4468 = vmatpush3.bf16.msra.mxu1 %v5252_v44 }
 0x375   :  { %4447 = vmatprep.subr.bf16.mxu0 %v5253_v19  ;;  %4469 = vmatprep.subr.bf16.mxu1 %v5254_v45 }
 0x378   :  { %4448 = vmatpush3.bf16.msra.mxu0 %v5255_v46  ;;  %4470 = vmatpush3.bf16.msra.mxu1 %v5256_v47 }
 0x42e   :  { %v3485_v53 = vpop.f32.mrb[8].mxu0  ;;  %v3567_v27 = vpop.f32.mrb[8].mxu1 }
 0x42f   :  { %v4485_v54 = vadd.f32 %v3485_v53, %v2753_v49  ;;  %v4487_v55 = vadd.f32 %v3567_v27, %v2761_v50  ;;  %v3487_v57 = vpop.f32.mrb[9].mxu0  ;;  %v3569_v58 = vpop.f32.mrb[9].mxu1 }
 0x430   :  { %v4486_v59 = vadd.f32 %v3487_v57, %v2757_v11  ;;  %v4488_v60 = vadd.f32 %v3569_v58, %v2765_v51  ;;  %v3489_v61 = vpop.f32.mrb[10].mxu0  ;;  %v3571_v62 = vpop.f32.mrb[10].mxu1 }
 0x431   :  { %v3490_v63 = vpop.f32.mrb[11].mxu0  ;;  %v3572_v0 = vpop.f32.mrb[11].mxu1  ;;  %v3574_v2 = vpack.c.bf16 %v4485_v54, %v4485_v54  ;;  %v3576_v36 = vpack.c.bf16 %v4487_v55, %v4487_v55 }
 0x432   :  { %v3575_v1 = vpack.c.bf16 %v4486_v59, %v4486_v59  ;;  %v3577_v20 = vpack.c.bf16 %v4488_v60, %v4488_v60 }
 0x434   :  { %3873 = vmatprep.mubr.bf16.mxu0 %v3575_v1  ;;  %3913 = vmatprep.mubr.bf16.mxu1 %v3577_v20 }
 0x435   :  { %3874 = vmatmul.mubr.bf16.vlgmr.msra.gmra.mrb[12].mxu0 %v3574_v2  ;;  %3914 = vmatmul.mubr.bf16.vlgmr.msra.gmra.mrb[12].mxu1 %v3576_v36 }
 0x508   :  { %v4449_v21 = vpop.f32.mrb[12].mxu0  ;;  %v4471_v22 = vpop.f32.mrb[12].mxu1 }
 0x509   :  { %v4450_v4 = vpop.f32.mrb[13].mxu0  ;;  %v4472_v5 = vpop.f32.mrb[13].mxu1 }
 0x50a   :  { %v4451_v6 = vadd.f32 %v4450_v4, %v4449_v21  ;;  %v4473_v7 = vadd.f32 %v4472_v5, %v4471_v22  ;;  %v4452_v8 = vpop.f32.mrb[14].mxu0  ;;  %v4474_v9 = vpop.f32.mrb[14].mxu1 }
 0x50b   :  { %v4453_v10 = vpop.f32.mrb[15].mxu0  ;;  %v4475_v12 = vpop.f32.mrb[15].mxu1 }
 0x50c   :  { %v3876_v13 = vadd.f32 %v4451_v6, %v4400_v3 }
 0x50e   :  { %v3916_v14 = vadd.f32 %v4473_v7, %v3876_v13 }
 0x510   :  { %3921 = vst [vmem:[#allocation11] sm:$0xff] %v3916_v14 }
 0x511   :  { %5378 = shalt.err (!%p5375_p2)
}
 0x512   :  { %s5379_s14 = scalar_lea.hbm %s5616_s9, 128 }
 0x513   :  { %p5380_p3 = scmp.ne.s32.totalorder %s5616_s9, %s5379_s14  ;;  %p5383_p4 = scmp.lt.u32.totalorder %s5379_s14, %s5616_s9 }
 0x515   :  { %p5385_p5 = pnand %p5383_p4, %p5380_p3 }
 0x517   :  { %5388 = shalt.err (!%p5385_p5)
}
 0x518   :  { %3931 = dma.vmem_to_hbm [thread:$0]  %s3929_s13, 128, %s5616_s9, [#allocation4]  }
 0x519   :  { %5395 = dma.done.wait [#allocation4], 128  }
 0x51a   :  { %5396 = vsyncadd [#allocation4], 4294967168 }
 0x51b   :  { %3935 = vsyncpa [#allocation3], 1 }
 0x51c   :  { %3936 = vsyncpa [#allocation6], 1 }
 0x51d   :  { %3937 = vsyncpa [#allocation9], 1 }
 0x51e   :  { %3938 = vsyncpa [#allocation4], 1 }

</bundles_post_ra>
